<compile_context>
chip_gen: v7x
topology: tpu7x:2x2x1
jax: 0.10.0
libtpu: 0.0.40
codegen_flags: <defaults>
</compile_context>

<pallas_src>
import functools
import math

import jax
import jax.numpy as jnp
from jax.experimental import pallas as pl
from jax.experimental.pallas import tpu as pltpu


# ----------------------------- Pallas kernel --------------------------------


def _hgt_layer_kernel(src_ids_ref, dst_ids_ref,                     # scalar prefetch (SMEM)
                      h_ref, adj_ref, wk_ref, bk_ref, wv_ref, bv_ref,
                      wq_ref, bq_ref, hmask_ref, wa_ref, ba_ref, oma_ref,
                      out_ref, acc_ref, qe_ref, *, n_heads, num_types):
  r = pl.program_id(0)
  n_rel = pl.num_programs(0)

  hmask = hmask_ref[...]                       # (H, 1, out) head -> lane-block mask

  @pl.when(r == 0)
  def _prologue():
    acc_ref[...] = jnp.zeros_like(acc_ref)
    # Q depends only on the destination node type -> compute once per type and
    # keep the head-stacked, head-masked copy resident in VMEM (bf16).
    for tid in range(num_types):
      q = jnp.dot(h_ref[tid], wq_ref[tid],
                  preferred_element_type=jnp.float32) + bq_ref[tid]     # (N, out) f32
      qe = (q[None, :, :] * hmask).reshape(n_heads * q.shape[0], q.shape[1])
      qe_ref[tid] = qe.astype(jnp.bfloat16)

  sid = src_ids_ref[r]
  did = dst_ids_ref[r]

  h_src = h_ref[sid]                           # (N, in) bf16
  adj = adj_ref[...].astype(jnp.float32)       # (N_dst, N_src) {0,1}

  # Relation-folded K/V projections (rel_att*pri/sqrt(dk), rel_msg already folded
  # into the weights wrapper-side): two direct bf16 MXU matmuls, f32 accumulate.
  k = jnp.dot(h_src, wk_ref[...], preferred_element_type=jnp.float32) + bk_ref[...]
  v = jnp.dot(h_src, wv_ref[...], preferred_element_type=jnp.float32) + bv_ref[...]

  n_dst, n_src = adj.shape
  out_dim = k.shape[1]

  # Attention logits for ALL heads in one matmul (heads stacked on sublanes):
  #   scores[h*N + d, s] = <q_h[d], k_h[s]> * pri_h / sqrt(d_k)
  qe = qe_ref[did]                                                      # (H*N, out) bf16
  scores = jax.lax.dot_general(qe, k.astype(jnp.bfloat16),
                               (((1,), (1,)), ((), ())),
                               preferred_element_type=jnp.float32)      # (H*N, N)
  scores3 = scores.reshape(n_heads, n_dst, n_src)

  # Additive mask bias built ONCE per relation (no H-way adjacency broadcast).
  bias = (adj - 1.0) * 1e30                                             # 0 / -1e30
  masked = scores3 + bias[None]                                         # (H, N, N) f32
  m = jnp.max(masked, axis=-1, keepdims=True)
  e = jnp.exp(masked - m)
  den = jnp.sum(e, axis=-1, keepdims=True)                              # >= 1, safe
  attn = e * pl.reciprocal(den, approx=True)                            # (H, N, N) f32

  # Aggregate all heads in one bf16 matmul, then fold heads back onto lanes.
  agg = jnp.dot(attn.reshape(n_heads * n_dst, n_src).astype(jnp.bfloat16),
                v.astype(jnp.bfloat16),
                preferred_element_type=jnp.float32)                     # (H*N, out) f32
  t = jnp.sum(agg.reshape(n_heads, n_dst, out_dim) * hmask, axis=0)     # (N, out) f32

  # Destination nodes with no incoming edge of this relation receive no message.
  row_valid = jnp.max(adj, axis=1, keepdims=True) > 0.0
  t = jnp.where(row_valid, t, 0.0)

  acc_ref[did] = acc_ref[did] + t

  @pl.when(r == n_rel - 1)
  def _epilogue():
    # multi_update_all(cross_reducer='mean') + a_linear + gated skip per node
    # type.  alpha = sigmoid(skip) and the 1/num_relations mean are folded into
    # wa/ba wrapper-side (parameter-only); oma = 1 - alpha.
    for tid in range(num_types):
      trans = jnp.dot(acc_ref[tid], wa_ref[tid],
                      preferred_element_type=jnp.float32) + ba_ref[tid]
      # TODO(synk): nn.Dropout(0.2) implemented as identity (eval-mode forward).
      # TODO(synk): use_norm=True LayerNorm epilogue not implemented.
      out_ref[tid] = trans + h_ref[tid].astype(jnp.float32) * oma_ref[tid]


# ------------------------------ JAX wrapper ----------------------------------


def _block_diag(blocks):
  """(H, d, d) -> (H*d, H*d) block-diagonal matrix (parameter-only, wrapper-side)."""
  h, d, _ = blocks.shape
  eye = jnp.eye(h, dtype=blocks.dtype)
  return jnp.einsum("hab,hg->hagb", blocks, eye).reshape(h * d, h * d)


def hgt_layer_forward(h, params, graph, *, n_heads, d_k):
  node_dict = graph["node_dict"]
  edge_dict = graph["edge_dict"]
  canonical = graph["canonical_etypes"]
  adjs = graph["adjs"]

  num_types = len(node_dict)
  num_rel = len(canonical)
  in_dim = params["wk"].shape[1]
  out_dim = params["wk"].shape[2]
  assert in_dim == out_dim, "gated skip connection requires in_dim == out_dim"

  type_names = sorted(node_dict, key=node_dict.get)
  counts = {nt: h[nt].shape[0] for nt in node_dict}
  # bf16-friendly sublane-aligned node count (multiple of 16).
  n_pad = max(16, ((max(counts.values()) + 15) // 16) * 16)

  h_all = jnp.stack([jnp.pad(h[nt].astype(jnp.float32),
                             ((0, n_pad - counts[nt]), (0, 0)))
                     for nt in type_names]).astype(jnp.bfloat16)
  adj_all = jnp.stack([jnp.pad(a.astype(jnp.float32),
                               ((0, n_pad - a.shape[0]), (0, n_pad - a.shape[1])))
                       for a in adjs]).astype(jnp.bfloat16)

  src_ids = [node_dict[s] for (s, _, _) in canonical]
  dst_ids = [node_dict[d] for (_, _, d) in canonical]
  eids = [edge_dict[e] for (_, e, _) in canonical]

  # Fold per-head relation transforms (+ relation_pri / sqrt(d_k)) directly into
  # the K / V projection weights & biases.  Parameter-only, numerically identical.
  wk_list, bk_list, wv_list, bv_list = [], [], [], []
  for s, eid in zip(src_ids, eids):
    scale = params["rel_pri"][eid] / math.sqrt(d_k)                      # (H,)
    bd_att = _block_diag(params["rel_att"][eid] * scale[:, None, None])  # (out, out)
    bd_msg = _block_diag(params["rel_msg"][eid])
    wk_list.append(params["wk"][s] @ bd_att)
    bk_list.append(params["bk"][s] @ bd_att)
    wv_list.append(params["wv"][s] @ bd_msg)
    bv_list.append(params["bv"][s] @ bd_msg)
  wk_eff = jnp.stack(wk_list).astype(jnp.bfloat16)       # (R, in, out)
  bk_eff = jnp.stack(bk_list).astype(jnp.float32)        # (R, 1, out)
  wv_eff = jnp.stack(wv_list).astype(jnp.bfloat16)
  bv_eff = jnp.stack(bv_list).astype(jnp.float32)

  # Q is per destination-type only -> not duplicated per relation.
  wq_all = params["wq"].astype(jnp.bfloat16)             # (T, in, out)
  bq_all = params["bq"].astype(jnp.float32)              # (T, 1, out)

  # Head -> lane-block mask (heads are stacked on sublanes inside the kernel).
  lane_head = jnp.arange(out_dim) // d_k
  hmask = (lane_head[None, :] == jnp.arange(n_heads)[:, None]
           ).astype(jnp.float32)[:, None, :]              # (H, 1, out)

  # Parameter-only folds for the epilogue: alpha = sigmoid(skip), cross-relation
  # mean 1/count folded into the a_linear weights.
  cnt = [0] * num_types
  for d in dst_ids:
    cnt[d] += 1
  inv_cnt = jnp.asarray([1.0 / max(c, 1) for c in cnt], jnp.float32)
  alphas = jax.nn.sigmoid(params["skip"]).astype(jnp.float32)            # (T,)
  wa_eff = params["wa"] * (alphas * inv_cnt)[:, None, None]
  ba_eff = params["ba"] * alphas[:, None, None]
  oma = (1.0 - alphas).reshape(num_types, 1, 1)

  src_ids_a = jnp.asarray(src_ids, jnp.int32)
  dst_ids_a = jnp.asarray(dst_ids, jnp.int32)

  kernel = functools.partial(_hgt_layer_kernel, n_heads=n_heads, num_types=num_types)

  grid_spec = pltpu.PrefetchScalarGridSpec(
      num_scalar_prefetch=2,             # src_ids, dst_ids (SMEM)
      grid=(num_rel,),
      in_specs=[
          pl.BlockSpec((num_types, n_pad, in_dim), lambda r, *_: (0, 0, 0)),    # h_all
          pl.BlockSpec((None, n_pad, n_pad), lambda r, *_: (r, 0, 0)),          # adj
          pl.BlockSpec((None, in_dim, out_dim), lambda r, *_: (r, 0, 0)),       # wk_eff
          pl.BlockSpec((None, 1, out_dim), lambda r, *_: (r, 0, 0)),            # bk_eff
          pl.BlockSpec((None, in_dim, out_dim), lambda r, *_: (r, 0, 0)),       # wv_eff
          pl.BlockSpec((None, 1, out_dim), lambda r, *_: (r, 0, 0)),            # bv_eff
          pl.BlockSpec((num_types, in_dim, out_dim), lambda r, *_: (0, 0, 0)),  # wq_all
          pl.BlockSpec((num_types, 1, out_dim), lambda r, *_: (0, 0, 0)),       # bq_all
          pl.BlockSpec((n_heads, 1, out_dim), lambda r, *_: (0, 0, 0)),         # hmask
          pl.BlockSpec((num_types, out_dim, out_dim), lambda r, *_: (0, 0, 0)), # wa_eff
          pl.BlockSpec((num_types, 1, out_dim), lambda r, *_: (0, 0, 0)),       # ba_eff
          pl.BlockSpec((num_types, 1, 1), lambda r, *_: (0, 0, 0)),             # 1-alpha
      ],
      out_specs=pl.BlockSpec((num_types, n_pad, out_dim), lambda r, *_: (0, 0, 0)),
      scratch_shapes=[
          pltpu.VMEM((num_types, n_pad, out_dim), jnp.float32),                 # acc
          pltpu.VMEM((num_types, n_heads * n_pad, out_dim), jnp.bfloat16),      # qe
      ],
  )

  flops = num_rel * (2 * 2 * n_pad * in_dim * out_dim                   # K and V proj
                     + 2 * 2 * n_heads * n_pad * n_pad * out_dim)       # logits + agg
  flops += num_types * 2 * n_pad * in_dim * out_dim                     # Q prologue
  flops += num_types * 2 * n_pad * out_dim * out_dim                    # a_linear

  def _nbytes(a):
    return int(a.size) * a.dtype.itemsize
  bytes_accessed = sum(_nbytes(a) for a in
                       (h_all, adj_all, wk_eff, bk_eff, wv_eff, bv_eff,
                        wq_all, bq_all, hmask, wa_eff, ba_eff, oma))
  bytes_accessed += 4 * num_types * n_pad * out_dim                     # output

  out_all = pl.pallas_call(
      kernel,
      grid_spec=grid_spec,
      out_shape=jax.ShapeDtypeStruct((num_types, n_pad, out_dim), jnp.float32),
      compiler_params=pltpu.CompilerParams(
          dimension_semantics=("arbitrary",),        # relation axis MUST be sequential
          vmem_limit_bytes=64 * 1024 * 1024),
      cost_estimate=pl.CostEstimate(
          flops=int(flops),
          transcendentals=int(num_rel * n_heads * n_pad * n_pad),
          bytes_accessed=int(bytes_accessed)),
  )(src_ids_a, dst_ids_a,
    h_all, adj_all, wk_eff, bk_eff, wv_eff, bv_eff,
    wq_all, bq_all, hmask, wa_eff, ba_eff, oma)

  return {nt: out_all[node_dict[nt], :counts[nt], :] for nt in node_dict}


# ------------------------- reference (pure jnp) -------------------------------


def hgt_layer_reference(h, params, graph, *, n_heads, d_k):
  node_dict = graph["node_dict"]
  edge_dict = graph["edge_dict"]
  out_dim = params["wk"].shape[-1]
  sqrt_dk = math.sqrt(d_k)
  acc = {nt: [] for nt in node_dict}
  for (src, et, dst), adj in zip(graph["canonical_etypes"], graph["adjs"]):
    sid, did, eid = node_dict[src], node_dict[dst], edge_dict[et]
    k = (h[src] @ params["wk"][sid] + params["bk"][sid]).reshape(-1, n_heads, d_k)
    v = (h[src] @ params["wv"][sid] + params["bv"][sid]).reshape(-1, n_heads, d_k)
    q = (h[dst] @ params["wq"][did] + params["bq"][did]).reshape(-1, n_heads, d_k)
    k = jnp.einsum("bij,ijk->bik", k, params["rel_att"][eid])
    v = jnp.einsum("bij,ijk->bik", v, params["rel_msg"][eid])
    scores = jnp.einsum("dhj,shj->dsh", q, k) * params["rel_pri"][eid] / sqrt_dk
    mask = adj[:, :, None] > 0
    masked = jnp.where(mask, scores, -1e30)
    m = jnp.max(masked, axis=1, keepdims=True)
    e = jnp.exp(masked - m) * adj[:, :, None]
    den = jnp.sum(e, axis=1, keepdims=True)
    attn = jnp.where(den > 0, e / den, 0.0)
    t = jnp.einsum("dsh,shk->dhk", attn, v).reshape(-1, out_dim)
    acc[dst].append(t)
  new_h = {}
  for nt, nid in node_dict.items():
    t_mean = jnp.mean(jnp.stack(acc[nt], 0), 0)
    alpha = jax.nn.sigmoid(params["skip"][nid])
    trans = t_mean @ params["wa"][nid] + params["ba"][nid]
    new_h[nt] = trans * alpha + h[nt] * (1.0 - alpha)
  return new_h


# ------------------------------- params init ----------------------------------


def init_params(key, num_types, num_relations, in_dim, out_dim, n_heads):
  d_k = out_dim // n_heads
  keys = jax.random.split(key, 10)
  params = {
      "wk": 0.1 * jax.random.normal(keys[0], (num_types, in_dim, out_dim), jnp.float32),
      "wq": 0.1 * jax.random.normal(keys[1], (num_types, in_dim, out_dim), jnp.float32),
      "wv": 0.1 * jax.random.normal(keys[2], (num_types, in_dim, out_dim), jnp.float32),
      "wa": 0.1 * jax.random.normal(keys[3], (num_types, out_dim, out_dim), jnp.float32),
      "bk": 0.05 * jax.random.normal(keys[4], (num_types, 1, out_dim), jnp.float32),
      "bq": 0.05 * jax.random.normal(keys[5], (num_types, 1, out_dim), jnp.float32),
      "bv": 0.05 * jax.random.normal(keys[6], (num_types, 1, out_dim), jnp.float32),
      "ba": 0.05 * jax.random.normal(keys[7], (num_types, 1, out_dim), jnp.float32),
      "rel_pri": jnp.ones((num_relations, n_heads), jnp.float32),   # torch.ones
      "skip": jnp.ones((num_types,), jnp.float32),                  # torch.ones
  }
  a = math.sqrt(6.0 / (d_k + d_k))                                  # xavier_uniform
  params["rel_att"] = jax.random.uniform(
      keys[8], (num_relations, n_heads, d_k, d_k), jnp.float32, -a, a)
  params["rel_msg"] = jax.random.uniform(
      keys[9], (num_relations, n_heads, d_k, d_k), jnp.float32, -a, a)
  return params


if __name__ == "__main__":
  in_dim = 32        # skip connection requires in_dim == out_dim
  out_dim = 32
  n_heads = 4
  d_k = out_dim // n_heads

  node_dict = {"paper": 0, "author": 1}
  edge_dict = {"writes": 0, "cites": 1, "rev_writes": 2}
  canonical_etypes = [("author", "writes", "paper"),
                      ("paper", "cites", "paper"),
                      ("paper", "rev_writes", "author")]
  node_counts = {"paper": 16, "author": 8}

  key = jax.random.PRNGKey(0)
  k_feat, k_adj, k_par = jax.random.split(key, 3)

  h = {}
  for i, (nt, n) in enumerate(node_counts.items()):
    h[nt] = jax.random.normal(jax.random.fold_in(k_feat, i), (n, in_dim), jnp.float32)

  adjs = []
  for i, (src, et, dst) in enumerate(canonical_etypes):
    kk = jax.random.fold_in(k_adj, i)
    adjs.append((jax.random.uniform(
        kk, (node_counts[dst], node_counts[src])) < 0.5).astype(jnp.float32))

  graph = {"node_dict": node_dict, "edge_dict": edge_dict,
           "canonical_etypes": canonical_etypes, "adjs": adjs}

  params = init_params(k_par, len(node_dict), len(edge_dict),
                       in_dim, out_dim, n_heads)

  out = hgt_layer_forward(h, params, graph, n_heads=n_heads, d_k=d_k)
  out = jax.tree_util.tree_map(jax.block_until_ready, out)

  with jax.default_matmul_precision("highest"):
    ref = hgt_layer_reference(h, params, graph, n_heads=n_heads, d_k=d_k)

  for nt in node_dict:
    err = float(jnp.max(jnp.abs(out[nt] - ref[nt])))
    assert err < 2e-2, f"mismatch for node type {nt}: max abs err {err}"

  print("KERNEL_OK")
</pallas_src>

<mosaic_0001>
module attributes {stable_mosaic.version = 11 : i64} {
  func.func @_hgt_layer_kernel(%arg0: i32, %arg1: memref<3xi32, #tpu.memory_space<smem>>, %arg2: memref<3xi32, #tpu.memory_space<smem>>, %arg3: memref<2x16x32xbf16, #tpu.memory_space<vmem>>, %arg4: memref<1x16x16xbf16, #tpu.memory_space<vmem>>, %arg5: memref<1x32x32xbf16, #tpu.memory_space<vmem>>, %arg6: memref<1x1x32xf32, #tpu.memory_space<vmem>>, %arg7: memref<1x32x32xbf16, #tpu.memory_space<vmem>>, %arg8: memref<1x1x32xf32, #tpu.memory_space<vmem>>, %arg9: memref<2x32x32xbf16, #tpu.memory_space<vmem>>, %arg10: memref<2x1x32xf32, #tpu.memory_space<vmem>>, %arg11: memref<4x1x32xf32, #tpu.memory_space<vmem>>, %arg12: memref<2x32x32xf32, #tpu.memory_space<vmem>>, %arg13: memref<2x1x32xf32, #tpu.memory_space<vmem>>, %arg14: memref<2x1x1xf32, #tpu.memory_space<vmem>>, %arg15: memref<2x16x32xf32, #tpu.memory_space<vmem>>, %arg16: memref<2x16x32xf32, #tpu.memory_space<vmem>>, %arg17: memref<2x64x32xbf16, #tpu.memory_space<vmem>>) attributes {dimension_semantics = [#tpu.dimension_semantics<arbitrary>], iteration_bounds = array<i64: 3>, scalar_prefetch = 2 : i64, scratch_operands = 2 : i64, tpu.core_type = #tpu.core_type<tc>, window_params = [{pipeline_mode = #tpu.pipeline_mode<synchronous>, transform_indices = @transform_0, window_bounds = array<i64: 2, 16, 32>}, {transform_indices = @transform_1, window_bounds = array<i64: 1, 16, 16>}, {transform_indices = @transform_2, window_bounds = array<i64: 1, 32, 32>}, {transform_indices = @transform_3, window_bounds = array<i64: 1, 1, 32>}, {transform_indices = @transform_4, window_bounds = array<i64: 1, 32, 32>}, {transform_indices = @transform_5, window_bounds = array<i64: 1, 1, 32>}, {pipeline_mode = #tpu.pipeline_mode<synchronous>, transform_indices = @transform_6, window_bounds = array<i64: 2, 32, 32>}, {pipeline_mode = #tpu.pipeline_mode<synchronous>, transform_indices = @transform_7, window_bounds = array<i64: 2, 1, 32>}, {pipeline_mode = #tpu.pipeline_mode<synchronous>, transform_indices = @transform_8, window_bounds = array<i64: 4, 1, 32>}, {pipeline_mode = #tpu.pipeline_mode<synchronous>, transform_indices = @transform_9, window_bounds = array<i64: 2, 32, 32>}, {pipeline_mode = #tpu.pipeline_mode<synchronous>, transform_indices = @transform_10, window_bounds = array<i64: 2, 1, 32>}, {pipeline_mode = #tpu.pipeline_mode<synchronous>, transform_indices = @transform_11, window_bounds = array<i64: 2, 1, 1>}, {pipeline_mode = #tpu.pipeline_mode<synchronous>, transform_indices = @transform_12, window_bounds = array<i64: 2, 16, 32>}]} {
    %c0 = arith.constant 0 : index
    %c0_0 = arith.constant 0 : index
    %c0_1 = arith.constant 0 : index
    %0 = vector.load %arg11[%c0, %c0_0, %c0_1] : memref<4x1x32xf32, #tpu.memory_space<vmem>>, vector<4x1x32xf32>
    %c0_i32 = arith.constant 0 : i32
    %1 = arith.cmpi eq, %arg0, %c0_i32 : i32
    %2 = arith.extui %1 : i1 to i32
    %c0_i32_2 = arith.constant 0 : i32
    %3 = arith.cmpi ne, %2, %c0_i32_2 : i32
    scf.if %3 {
      %cst_38 = arith.constant 0.000000e+00 : f32
      %78 = vector.broadcast %cst_38 : f32 to vector<2x16x32xf32>
      %c0_39 = arith.constant 0 : index
      %c0_40 = arith.constant 0 : index
      %c0_41 = arith.constant 0 : index
      %79 = vector.load %arg16[%c0_39, %c0_40, %c0_41] : memref<2x16x32xf32, #tpu.memory_space<vmem>>, vector<2x16x32xf32>
      tpu.vector_store %arg16[%c0_39, %c0_40, %c0_41], %78 {strides = array<i32>} : memref<2x16x32xf32, #tpu.memory_space<vmem>>, vector<2x16x32xf32>,
      %c0_42 = arith.constant 0 : index
      %c0_43 = arith.constant 0 : index
      %c0_44 = arith.constant 0 : index
      %80 = vector.load %arg3[%c0_42, %c0_43, %c0_44] : memref<2x16x32xbf16, #tpu.memory_space<vmem>>, vector<1x16x32xbf16>
      %81 = vector.shape_cast %80 : vector<1x16x32xbf16> to vector<16x32xbf16>
      %c0_45 = arith.constant 0 : index
      %c0_46 = arith.constant 0 : index
      %c0_47 = arith.constant 0 : index
      %82 = vector.load %arg9[%c0_45, %c0_46, %c0_47] : memref<2x32x32xbf16, #tpu.memory_space<vmem>>, vector<1x32x32xbf16>
      %83 = vector.shape_cast %82 : vector<1x32x32xbf16> to vector<32x32xbf16>
      %cst_48 = arith.constant dense<0.000000e+00> : vector<16x32xf32>
      %84 = tpu.matmul %81, %83, %cst_48 {dimension_numbers = #tpu.dot_dimension_numbers<[1], [0], [0], [1], [0, 0, 1, 1], [], []>} : vector<16x32xbf16>, vector<32x32xbf16>, vector<16x32xf32> -> vector<16x32xf32>
      %c0_49 = arith.constant 0 : index
      %c0_50 = arith.constant 0 : index
      %c0_51 = arith.constant 0 : index
      %85 = vector.load %arg10[%c0_49, %c0_50, %c0_51] : memref<2x1x32xf32, #tpu.memory_space<vmem>>, vector<1x1x32xf32>
      %86 = vector.shape_cast %85 : vector<1x1x32xf32> to vector<1x32xf32>
      %87 = vector.broadcast %86 : vector<1x32xf32> to vector<16x32xf32>
      %88 = arith.addf %84, %87 : vector<16x32xf32>
      %89 = vector.shape_cast %88 : vector<16x32xf32> to vector<1x16x32xf32>
      %90 = vector.broadcast %89 : vector<1x16x32xf32> to vector<4x16x32xf32>
      %91 = vector.broadcast %0 : vector<4x1x32xf32> to vector<4x16x32xf32>
      %92 = arith.mulf %90, %91 : vector<4x16x32xf32>
      %93 = vector.shape_cast %92 : vector<4x16x32xf32> to vector<64x32xf32>
      %94 = arith.truncf %93 : vector<64x32xf32> to vector<64x32xbf16>
      %c0_52 = arith.constant 0 : index
      %c0_53 = arith.constant 0 : index
      %c0_54 = arith.constant 0 : index
      %95 = vector.load %arg17[%c0_52, %c0_53, %c0_54] : memref<2x64x32xbf16, #tpu.memory_space<vmem>>, vector<1x64x32xbf16>
      %96 = vector.shape_cast %95 : vector<1x64x32xbf16> to vector<64x32xbf16>
      %97 = vector.shape_cast %94 : vector<64x32xbf16> to vector<1x64x32xbf16>
      tpu.vector_store %arg17[%c0_52, %c0_53, %c0_54], %97 {strides = array<i32>} : memref<2x64x32xbf16, #tpu.memory_space<vmem>>, vector<1x64x32xbf16>,
      %c1 = arith.constant 1 : index
      %c0_55 = arith.constant 0 : index
      %c0_56 = arith.constant 0 : index
      %98 = vector.load %arg3[%c1, %c0_55, %c0_56] : memref<2x16x32xbf16, #tpu.memory_space<vmem>>, vector<1x16x32xbf16>
      %99 = vector.shape_cast %98 : vector<1x16x32xbf16> to vector<16x32xbf16>
      %c1_57 = arith.constant 1 : index
      %c0_58 = arith.constant 0 : index
      %c0_59 = arith.constant 0 : index
      %100 = vector.load %arg9[%c1_57, %c0_58, %c0_59] : memref<2x32x32xbf16, #tpu.memory_space<vmem>>, vector<1x32x32xbf16>
      %101 = vector.shape_cast %100 : vector<1x32x32xbf16> to vector<32x32xbf16>
      %cst_60 = arith.constant dense<0.000000e+00> : vector<16x32xf32>
      %102 = tpu.matmul %99, %101, %cst_60 {dimension_numbers = #tpu.dot_dimension_numbers<[1], [0], [0], [1], [0, 0, 1, 1], [], []>} : vector<16x32xbf16>, vector<32x32xbf16>, vector<16x32xf32> -> vector<16x32xf32>
      %c1_61 = arith.constant 1 : index
      %c0_62 = arith.constant 0 : index
      %c0_63 = arith.constant 0 : index
      %103 = vector.load %arg10[%c1_61, %c0_62, %c0_63] : memref<2x1x32xf32, #tpu.memory_space<vmem>>, vector<1x1x32xf32>
      %104 = vector.shape_cast %103 : vector<1x1x32xf32> to vector<1x32xf32>
      %105 = vector.broadcast %104 : vector<1x32xf32> to vector<16x32xf32>
      %106 = arith.addf %102, %105 : vector<16x32xf32>
      %107 = vector.shape_cast %106 : vector<16x32xf32> to vector<1x16x32xf32>
      %108 = vector.broadcast %107 : vector<1x16x32xf32> to vector<4x16x32xf32>
      %109 = vector.broadcast %0 : vector<4x1x32xf32> to vector<4x16x32xf32>
      %110 = arith.mulf %108, %109 : vector<4x16x32xf32>
      %111 = vector.shape_cast %110 : vector<4x16x32xf32> to vector<64x32xf32>
      %112 = arith.truncf %111 : vector<64x32xf32> to vector<64x32xbf16>
      %c1_64 = arith.constant 1 : index
      %c0_65 = arith.constant 0 : index
      %c0_66 = arith.constant 0 : index
      %113 = vector.load %arg17[%c1_64, %c0_65, %c0_66] : memref<2x64x32xbf16, #tpu.memory_space<vmem>>, vector<1x64x32xbf16>
      %114 = vector.shape_cast %113 : vector<1x64x32xbf16> to vector<64x32xbf16>
      %115 = vector.shape_cast %112 : vector<64x32xbf16> to vector<1x64x32xbf16>
      tpu.vector_store %arg17[%c1_64, %c0_65, %c0_66], %115 {strides = array<i32>} : memref<2x64x32xbf16, #tpu.memory_space<vmem>>, vector<1x64x32xbf16>,
    } else {
    }
    %4 = arith.index_cast %arg0 : i32 to index
    %5 = memref.load %arg1[%4] : memref<3xi32, #tpu.memory_space<smem>>
    %6 = arith.index_cast %arg0 : i32 to index
    %7 = memref.load %arg2[%6] : memref<3xi32, #tpu.memory_space<smem>>
    %8 = arith.index_cast %5 : i32 to index
    %c0_3 = arith.constant 0 : index
    %c0_4 = arith.constant 0 : index
    %9 = vector.load %arg3[%8, %c0_3, %c0_4] : memref<2x16x32xbf16, #tpu.memory_space<vmem>>, vector<1x16x32xbf16>
    %10 = vector.shape_cast %9 : vector<1x16x32xbf16> to vector<16x32xbf16>
    %c0_5 = arith.constant 0 : index
    %c0_6 = arith.constant 0 : index
    %c0_7 = arith.constant 0 : index
    %11 = vector.load %arg4[%c0_5, %c0_6, %c0_7] : memref<1x16x16xbf16, #tpu.memory_space<vmem>>, vector<1x16x16xbf16>
    %12 = vector.shape_cast %11 : vector<1x16x16xbf16> to vector<16x16xbf16>
    %13 = arith.extf %12 : vector<16x16xbf16> to vector<16x16xf32>
    %c0_8 = arith.constant 0 : index
    %c0_9 = arith.constant 0 : index
    %c0_10 = arith.constant 0 : index
    %14 = vector.load %arg5[%c0_8, %c0_9, %c0_10] : memref<1x32x32xbf16, #tpu.memory_space<vmem>>, vector<1x32x32xbf16>
    %15 = vector.shape_cast %14 : vector<1x32x32xbf16> to vector<32x32xbf16>
    %cst = arith.constant dense<0.000000e+00> : vector<16x32xf32>
    %16 = tpu.matmul %10, %15, %cst {dimension_numbers = #tpu.dot_dimension_numbers<[1], [0], [0], [1], [0, 0, 1, 1], [], []>} : vector<16x32xbf16>, vector<32x32xbf16>, vector<16x32xf32> -> vector<16x32xf32>
    %c0_11 = arith.constant 0 : index
    %c0_12 = arith.constant 0 : index
    %c0_13 = arith.constant 0 : index
    %17 = vector.load %arg6[%c0_11, %c0_12, %c0_13] : memref<1x1x32xf32, #tpu.memory_space<vmem>>, vector<1x1x32xf32>
    %18 = vector.shape_cast %17 : vector<1x1x32xf32> to vector<1x32xf32>
    %19 = vector.broadcast %18 : vector<1x32xf32> to vector<16x32xf32>
    %20 = arith.addf %16, %19 : vector<16x32xf32>
    %c0_14 = arith.constant 0 : index
    %c0_15 = arith.constant 0 : index
    %c0_16 = arith.constant 0 : index
    %21 = vector.load %arg7[%c0_14, %c0_15, %c0_16] : memref<1x32x32xbf16, #tpu.memory_space<vmem>>, vector<1x32x32xbf16>
    %22 = vector.shape_cast %21 : vector<1x32x32xbf16> to vector<32x32xbf16>
    %cst_17 = arith.constant dense<0.000000e+00> : vector<16x32xf32>
    %23 = tpu.matmul %10, %22, %cst_17 {dimension_numbers = #tpu.dot_dimension_numbers<[1], [0], [0], [1], [0, 0, 1, 1], [], []>} : vector<16x32xbf16>, vector<32x32xbf16>, vector<16x32xf32> -> vector<16x32xf32>
    %c0_18 = arith.constant 0 : index
    %c0_19 = arith.constant 0 : index
    %c0_20 = arith.constant 0 : index
    %24 = vector.load %arg8[%c0_18, %c0_19, %c0_20] : memref<1x1x32xf32, #tpu.memory_space<vmem>>, vector<1x1x32xf32>
    %25 = vector.shape_cast %24 : vector<1x1x32xf32> to vector<1x32xf32>
    %26 = vector.broadcast %25 : vector<1x32xf32> to vector<16x32xf32>
    %27 = arith.addf %23, %26 : vector<16x32xf32>
    %28 = arith.index_cast %7 : i32 to index
    %c0_21 = arith.constant 0 : index
    %c0_22 = arith.constant 0 : index
    %29 = vector.load %arg17[%28, %c0_21, %c0_22] : memref<2x64x32xbf16, #tpu.memory_space<vmem>>, vector<1x64x32xbf16>
    %30 = vector.shape_cast %29 : vector<1x64x32xbf16> to vector<64x32xbf16>
    %31 = arith.truncf %20 : vector<16x32xf32> to vector<16x32xbf16>
    %cst_23 = arith.constant dense<0.000000e+00> : vector<64x16xf32>
    %32 = tpu.matmul %30, %31, %cst_23 {dimension_numbers = #tpu.dot_dimension_numbers<[1], [1], [0], [0], [0, 0, 1, 0], [], []>} : vector<64x32xbf16>, vector<16x32xbf16>, vector<64x16xf32> -> vector<64x16xf32>
    %33 = vector.shape_cast %32 : vector<64x16xf32> to vector<4x16x16xf32>
    %cst_24 = arith.constant 1.000000e+00 : f32
    %34 = vector.broadcast %cst_24 : f32 to vector<16x16xf32>
    %35 = arith.subf %13, %34 : vector<16x16xf32>
    %cst_25 = arith.constant 1.000000e+30 : f32
    %36 = vector.broadcast %cst_25 : f32 to vector<16x16xf32>
    %37 = arith.mulf %35, %36 : vector<16x16xf32>
    %38 = vector.shape_cast %37 : vector<16x16xf32> to vector<1x16x16xf32>
    %39 = vector.broadcast %38 : vector<1x16x16xf32> to vector<4x16x16xf32>
    %40 = arith.addf %33, %39 : vector<4x16x16xf32>
    %cst_26 = arith.constant dense<0xFF800000> : vector<4x16xf32>
    %41 = vector.multi_reduction <maximumf>, %40, %cst_26 [2] : vector<4x16x16xf32> to vector<4x16xf32>
    %42 = vector.shape_cast %41 : vector<4x16xf32> to vector<4x16x1xf32>
    %43 = vector.broadcast %42 : vector<4x16x1xf32> to vector<4x16x16xf32>
    %44 = arith.subf %40, %43 : vector<4x16x16xf32>
    %45 = math.exp %44 : vector<4x16x16xf32>
    %cst_27 = arith.constant dense<0.000000e+00> : vector<4x16xf32>
    %46 = vector.multi_reduction <add>, %45, %cst_27 [2] : vector<4x16x16xf32> to vector<4x16xf32>
    %47 = vector.shape_cast %46 : vector<4x16xf32> to vector<4x16x1xf32>
    %48 = tpu.reciprocal %47 {approx = true} : vector<4x16x1xf32> -> vector<4x16x1xf32>
    %49 = vector.broadcast %48 : vector<4x16x1xf32> to vector<4x16x16xf32>
    %50 = arith.mulf %45, %49 : vector<4x16x16xf32>
    %51 = vector.shape_cast %50 : vector<4x16x16xf32> to vector<64x16xf32>
    %52 = arith.truncf %51 : vector<64x16xf32> to vector<64x16xbf16>
    %53 = arith.truncf %27 : vector<16x32xf32> to vector<16x32xbf16>
    %cst_28 = arith.constant dense<0.000000e+00> : vector<64x32xf32>
    %54 = tpu.matmul %52, %53, %cst_28 {dimension_numbers = #tpu.dot_dimension_numbers<[1], [0], [0], [1], [0, 0, 1, 1], [], []>} : vector<64x16xbf16>, vector<16x32xbf16>, vector<64x32xf32> -> vector<64x32xf32>
    %55 = vector.shape_cast %54 : vector<64x32xf32> to vector<4x16x32xf32>
    %56 = vector.broadcast %0 : vector<4x1x32xf32> to vector<4x16x32xf32>
    %57 = arith.mulf %55, %56 : vector<4x16x32xf32>
    %cst_29 = arith.constant dense<0.000000e+00> : vector<16x32xf32>
    %58 = vector.multi_reduction <add>, %57, %cst_29 [0] : vector<4x16x32xf32> to vector<16x32xf32>
    %cst_30 = arith.constant dense<0xFF800000> : vector<16xf32>
    %59 = vector.multi_reduction <maximumf>, %13, %cst_30 [1] : vector<16x16xf32> to vector<16xf32>
    %60 = vector.shape_cast %59 : vector<16xf32> to vector<16x1xf32>
    %cst_31 = arith.constant 0.000000e+00 : f32
    %61 = vector.broadcast %cst_31 : f32 to vector<16x1xf32>
    %62 = arith.cmpf ogt, %60, %61 : vector<16x1xf32>
    %cst_32 = arith.constant 0.000000e+00 : f32
    %63 = vector.shape_cast %62 : vector<16x1xi1> to vector<16x1xi1>
    %64 = vector.broadcast %63 : vector<16x1xi1> to vector<16x32xi1>
    %65 = vector.broadcast %cst_32 : f32 to vector<16x32xf32>
    %66 = arith.select %64, %58, %65 : vector<16x32xi1>, vector<16x32xf32>
    %67 = arith.index_cast %7 : i32 to index
    %c0_33 = arith.constant 0 : index
    %c0_34 = arith.constant 0 : index
    %68 = vector.load %arg16[%67, %c0_33, %c0_34] : memref<2x16x32xf32, #tpu.memory_space<vmem>>, vector<1x16x32xf32>
    %69 = vector.shape_cast %68 : vector<1x16x32xf32> to vector<16x32xf32>
    %70 = arith.addf %69, %66 : vector<16x32xf32>
    %71 = arith.index_cast %7 : i32 to index
    %c0_35 = arith.constant 0 : index
    %c0_36 = arith.constant 0 : index
    %72 = vector.load %arg16[%71, %c0_35, %c0_36] : memref<2x16x32xf32, #tpu.memory_space<vmem>>, vector<1x16x32xf32>
    %73 = vector.shape_cast %72 : vector<1x16x32xf32> to vector<16x32xf32>
    %74 = vector.shape_cast %70 : vector<16x32xf32> to vector<1x16x32xf32>
    tpu.vector_store %arg16[%71, %c0_35, %c0_36], %74 {strides = array<i32>} : memref<2x16x32xf32, #tpu.memory_space<vmem>>, vector<1x16x32xf32>,
    %c2_i32 = arith.constant 2 : i32
    %75 = arith.cmpi eq, %arg0, %c2_i32 : i32
    %76 = arith.extui %75 : i1 to i32
    %c0_i32_37 = arith.constant 0 : i32
    %77 = arith.cmpi ne, %76, %c0_i32_37 : i32
    scf.if %77 {
      %c0_38 = arith.constant 0 : index
      %c0_39 = arith.constant 0 : index
      %c0_40 = arith.constant 0 : index
      %78 = vector.load %arg16[%c0_38, %c0_39, %c0_40] : memref<2x16x32xf32, #tpu.memory_space<vmem>>, vector<1x16x32xf32>
      %79 = vector.shape_cast %78 : vector<1x16x32xf32> to vector<16x32xf32>
      %c0_41 = arith.constant 0 : index
      %c0_42 = arith.constant 0 : index
      %c0_43 = arith.constant 0 : index
      %80 = vector.load %arg12[%c0_41, %c0_42, %c0_43] : memref<2x32x32xf32, #tpu.memory_space<vmem>>, vector<1x32x32xf32>
      %81 = vector.shape_cast %80 : vector<1x32x32xf32> to vector<32x32xf32>
      %cst_44 = arith.constant dense<0.000000e+00> : vector<16x32xf32>
      %82 = tpu.matmul %79, %81, %cst_44 {dimension_numbers = #tpu.dot_dimension_numbers<[1], [0], [0], [1], [0, 0, 1, 1], [], []>} : vector<16x32xf32>, vector<32x32xf32>, vector<16x32xf32> -> vector<16x32xf32>
      %c0_45 = arith.constant 0 : index
      %c0_46 = arith.constant 0 : index
      %c0_47 = arith.constant 0 : index
      %83 = vector.load %arg13[%c0_45, %c0_46, %c0_47] : memref<2x1x32xf32, #tpu.memory_space<vmem>>, vector<1x1x32xf32>
      %84 = vector.shape_cast %83 : vector<1x1x32xf32> to vector<1x32xf32>
      %85 = vector.broadcast %84 : vector<1x32xf32> to vector<16x32xf32>
      %86 = arith.addf %82, %85 : vector<16x32xf32>
      %c0_48 = arith.constant 0 : index
      %c0_49 = arith.constant 0 : index
      %c0_50 = arith.constant 0 : index
      %87 = vector.load %arg3[%c0_48, %c0_49, %c0_50] : memref<2x16x32xbf16, #tpu.memory_space<vmem>>, vector<1x16x32xbf16>
      %88 = vector.shape_cast %87 : vector<1x16x32xbf16> to vector<16x32xbf16>
      %89 = arith.extf %88 : vector<16x32xbf16> to vector<16x32xf32>
      %c0_51 = arith.constant 0 : index
      %c0_52 = arith.constant 0 : index
      %c0_53 = arith.constant 0 : index
      %90 = vector.load %arg14[%c0_51, %c0_52, %c0_53] : memref<2x1x1xf32, #tpu.memory_space<vmem>>, vector<1x1x1xf32>
      %91 = vector.shape_cast %90 : vector<1x1x1xf32> to vector<1x1xf32>
      %92 = vector.broadcast %91 : vector<1x1xf32> to vector<16x32xf32>
      %93 = arith.mulf %89, %92 : vector<16x32xf32>
      %94 = arith.addf %86, %93 : vector<16x32xf32>
      %c0_54 = arith.constant 0 : index
      %c0_55 = arith.constant 0 : index
      %c0_56 = arith.constant 0 : index
      %95 = vector.load %arg15[%c0_54, %c0_55, %c0_56] : memref<2x16x32xf32, #tpu.memory_space<vmem>>, vector<1x16x32xf32>
      %96 = vector.shape_cast %95 : vector<1x16x32xf32> to vector<16x32xf32>
      %97 = vector.shape_cast %94 : vector<16x32xf32> to vector<1x16x32xf32>
      tpu.vector_store %arg15[%c0_54, %c0_55, %c0_56], %97 {strides = array<i32>} : memref<2x16x32xf32, #tpu.memory_space<vmem>>, vector<1x16x32xf32>,
      %c1 = arith.constant 1 : index
      %c0_57 = arith.constant 0 : index
      %c0_58 = arith.constant 0 : index
      %98 = vector.load %arg16[%c1, %c0_57, %c0_58] : memref<2x16x32xf32, #tpu.memory_space<vmem>>, vector<1x16x32xf32>
      %99 = vector.shape_cast %98 : vector<1x16x32xf32> to vector<16x32xf32>
      %c1_59 = arith.constant 1 : index
      %c0_60 = arith.constant 0 : index
      %c0_61 = arith.constant 0 : index
      %100 = vector.load %arg12[%c1_59, %c0_60, %c0_61] : memref<2x32x32xf32, #tpu.memory_space<vmem>>, vector<1x32x32xf32>
      %101 = vector.shape_cast %100 : vector<1x32x32xf32> to vector<32x32xf32>
      %cst_62 = arith.constant dense<0.000000e+00> : vector<16x32xf32>
      %102 = tpu.matmul %99, %101, %cst_62 {dimension_numbers = #tpu.dot_dimension_numbers<[1], [0], [0], [1], [0, 0, 1, 1], [], []>} : vector<16x32xf32>, vector<32x32xf32>, vector<16x32xf32> -> vector<16x32xf32>
      %c1_63 = arith.constant 1 : index
      %c0_64 = arith.constant 0 : index
      %c0_65 = arith.constant 0 : index
      %103 = vector.load %arg13[%c1_63, %c0_64, %c0_65] : memref<2x1x32xf32, #tpu.memory_space<vmem>>, vector<1x1x32xf32>
      %104 = vector.shape_cast %103 : vector<1x1x32xf32> to vector<1x32xf32>
      %105 = vector.broadcast %104 : vector<1x32xf32> to vector<16x32xf32>
      %106 = arith.addf %102, %105 : vector<16x32xf32>
      %c1_66 = arith.constant 1 : index
      %c0_67 = arith.constant 0 : index
      %c0_68 = arith.constant 0 : index
      %107 = vector.load %arg3[%c1_66, %c0_67, %c0_68] : memref<2x16x32xbf16, #tpu.memory_space<vmem>>, vector<1x16x32xbf16>
      %108 = vector.shape_cast %107 : vector<1x16x32xbf16> to vector<16x32xbf16>
      %109 = arith.extf %108 : vector<16x32xbf16> to vector<16x32xf32>
      %c1_69 = arith.constant 1 : index
      %c0_70 = arith.constant 0 : index
      %c0_71 = arith.constant 0 : index
      %110 = vector.load %arg14[%c1_69, %c0_70, %c0_71] : memref<2x1x1xf32, #tpu.memory_space<vmem>>, vector<1x1x1xf32>
      %111 = vector.shape_cast %110 : vector<1x1x1xf32> to vector<1x1xf32>
      %112 = vector.broadcast %111 : vector<1x1xf32> to vector<16x32xf32>
      %113 = arith.mulf %109, %112 : vector<16x32xf32>
      %114 = arith.addf %106, %113 : vector<16x32xf32>
      %c1_72 = arith.constant 1 : index
      %c0_73 = arith.constant 0 : index
      %c0_74 = arith.constant 0 : index
      %115 = vector.load %arg15[%c1_72, %c0_73, %c0_74] : memref<2x16x32xf32, #tpu.memory_space<vmem>>, vector<1x16x32xf32>
      %116 = vector.shape_cast %115 : vector<1x16x32xf32> to vector<16x32xf32>
      %117 = vector.shape_cast %114 : vector<16x32xf32> to vector<1x16x32xf32>
      tpu.vector_store %arg15[%c1_72, %c0_73, %c0_74], %117 {strides = array<i32>} : memref<2x16x32xf32, #tpu.memory_space<vmem>>, vector<1x16x32xf32>,
    } else {
    }
    return
  }
  func.func @transform_0(%arg0: i32, %arg1: memref<3xi32, #tpu.memory_space<smem>>, %arg2: memref<3xi32, #tpu.memory_space<smem>>) -> (i32, i32, i32) {
    %c0_i32 = arith.constant 0 : i32
    %c0_i32_0 = arith.constant 0 : i32
    %c0_i32_1 = arith.constant 0 : i32
    %c0_i32_2 = arith.constant 0 : i32
    return %c0_i32, %c0_i32_0, %c0_i32_1 : i32, i32, i32
  }
  func.func @transform_1(%arg0: i32, %arg1: memref<3xi32, #tpu.memory_space<smem>>, %arg2: memref<3xi32, #tpu.memory_space<smem>>) -> (i32, i32, i32) {
    %c0_i32 = arith.constant 0 : i32
    %c0_i32_0 = arith.constant 0 : i32
    %c0_i32_1 = arith.constant 0 : i32
    return %arg0, %c0_i32, %c0_i32_0 : i32, i32, i32
  }
  func.func @transform_2(%arg0: i32, %arg1: memref<3xi32, #tpu.memory_space<smem>>, %arg2: memref<3xi32, #tpu.memory_space<smem>>) -> (i32, i32, i32) {
    %c0_i32 = arith.constant 0 : i32
    %c0_i32_0 = arith.constant 0 : i32
    %c0_i32_1 = arith.constant 0 : i32
    return %arg0, %c0_i32, %c0_i32_0 : i32, i32, i32
  }
  func.func @transform_3(%arg0: i32, %arg1: memref<3xi32, #tpu.memory_space<smem>>, %arg2: memref<3xi32, #tpu.memory_space<smem>>) -> (i32, i32, i32) {
    %c0_i32 = arith.constant 0 : i32
    %c0_i32_0 = arith.constant 0 : i32
    %c0_i32_1 = arith.constant 0 : i32
    return %arg0, %c0_i32, %c0_i32_0 : i32, i32, i32
  }
  func.func @transform_4(%arg0: i32, %arg1: memref<3xi32, #tpu.memory_space<smem>>, %arg2: memref<3xi32, #tpu.memory_space<smem>>) -> (i32, i32, i32) {
    %c0_i32 = arith.constant 0 : i32
    %c0_i32_0 = arith.constant 0 : i32
    %c0_i32_1 = arith.constant 0 : i32
    return %arg0, %c0_i32, %c0_i32_0 : i32, i32, i32
  }
  func.func @transform_5(%arg0: i32, %arg1: memref<3xi32, #tpu.memory_space<smem>>, %arg2: memref<3xi32, #tpu.memory_space<smem>>) -> (i32, i32, i32) {
    %c0_i32 = arith.constant 0 : i32
    %c0_i32_0 = arith.constant 0 : i32
    %c0_i32_1 = arith.constant 0 : i32
    return %arg0, %c0_i32, %c0_i32_0 : i32, i32, i32
  }
  func.func @transform_6(%arg0: i32, %arg1: memref<3xi32, #tpu.memory_space<smem>>, %arg2: memref<3xi32, #tpu.memory_space<smem>>) -> (i32, i32, i32) {
    %c0_i32 = arith.constant 0 : i32
    %c0_i32_0 = arith.constant 0 : i32
    %c0_i32_1 = arith.constant 0 : i32
    %c0_i32_2 = arith.constant 0 : i32
    return %c0_i32, %c0_i32_0, %c0_i32_1 : i32, i32, i32
  }
  func.func @transform_7(%arg0: i32, %arg1: memref<3xi32, #tpu.memory_space<smem>>, %arg2: memref<3xi32, #tpu.memory_space<smem>>) -> (i32, i32, i32) {
    %c0_i32 = arith.constant 0 : i32
    %c0_i32_0 = arith.constant 0 : i32
    %c0_i32_1 = arith.constant 0 : i32
    %c0_i32_2 = arith.constant 0 : i32
    return %c0_i32, %c0_i32_0, %c0_i32_1 : i32, i32, i32
  }
  func.func @transform_8(%arg0: i32, %arg1: memref<3xi32, #tpu.memory_space<smem>>, %arg2: memref<3xi32, #tpu.memory_space<smem>>) -> (i32, i32, i32) {
    %c0_i32 = arith.constant 0 : i32
    %c0_i32_0 = arith.constant 0 : i32
    %c0_i32_1 = arith.constant 0 : i32
    %c0_i32_2 = arith.constant 0 : i32
    return %c0_i32, %c0_i32_0, %c0_i32_1 : i32, i32, i32
  }
  func.func @transform_9(%arg0: i32, %arg1: memref<3xi32, #tpu.memory_space<smem>>, %arg2: memref<3xi32, #tpu.memory_space<smem>>) -> (i32, i32, i32) {
    %c0_i32 = arith.constant 0 : i32
    %c0_i32_0 = arith.constant 0 : i32
    %c0_i32_1 = arith.constant 0 : i32
    %c0_i32_2 = arith.constant 0 : i32
    return %c0_i32, %c0_i32_0, %c0_i32_1 : i32, i32, i32
  }
  func.func @transform_10(%arg0: i32, %arg1: memref<3xi32, #tpu.memory_space<smem>>, %arg2: memref<3xi32, #tpu.memory_space<smem>>) -> (i32, i32, i32) {
    %c0_i32 = arith.constant 0 : i32
    %c0_i32_0 = arith.constant 0 : i32
    %c0_i32_1 = arith.constant 0 : i32
    %c0_i32_2 = arith.constant 0 : i32
    return %c0_i32, %c0_i32_0, %c0_i32_1 : i32, i32, i32
  }
  func.func @transform_11(%arg0: i32, %arg1: memref<3xi32, #tpu.memory_space<smem>>, %arg2: memref<3xi32, #tpu.memory_space<smem>>) -> (i32, i32, i32) {
    %c0_i32 = arith.constant 0 : i32
    %c0_i32_0 = arith.constant 0 : i32
    %c0_i32_1 = arith.constant 0 : i32
    %c0_i32_2 = arith.constant 0 : i32
    return %c0_i32, %c0_i32_0, %c0_i32_1 : i32, i32, i32
  }
  func.func @transform_12(%arg0: i32, %arg1: memref<3xi32, #tpu.memory_space<smem>>, %arg2: memref<3xi32, #tpu.memory_space<smem>>) -> (i32, i32, i32) {
    %c0_i32 = arith.constant 0 : i32
    %c0_i32_0 = arith.constant 0 : i32
    %c0_i32_1 = arith.constant 0 : i32
    %c0_i32_2 = arith.constant 0 : i32
    return %c0_i32, %c0_i32_0, %c0_i32_1 : i32, i32, i32
  }
}

</mosaic_0001>

<bundles_post_ra>
// kernel: tpu_custom_call.1
= control target key start
LH: loop header
LB: loop body
LE: loop exit
PB: predicated region body
PF: predicated region fallthrough
CT: control target
= control target key end

     0   :  { %s3442_s0 = inlined_call_operand.hbm [shape: s32[3], index: 0, kind: input, shape index: {}]   ;;  %s3443_s2 = inlined_call_operand.hbm [shape: bf16[2,16,32], index: 2, kind: input, shape index: {}]   ;;  %s3444_s3 = inlined_call_operand.hbm [shape: bf16[3,16,16], index: 3, kind: input, shape index: {}]   ;;  %s3445_s4 = inlined_call_operand.hbm [shape: bf16[3,32,32], index: 4, kind: input, shape index: {}]   ;;  %s3446_s5 = inlined_call_operand.hbm [shape: f32[3,1,32], index: 5, kind: input, shape index: {}]   ;;  %s3447_s6 = inlined_call_operand.hbm [shape: bf16[3,32,32], index: 6, kind: input, shape index: {}]   ;;  %s3448_s7 = inlined_call_operand.hbm [shape: f32[3,1,32], index: 7, kind: input, shape index: {}]   ;;  %s3449_s8 = inlined_call_operand.hbm [shape: bf16[2,32,32], index: 8, kind: input, shape index: {}]   ;;  %s3450_s9 = inlined_call_operand.hbm [shape: f32[2,1,32], index: 9, kind: input, shape index: {}]   ;;  %s3451_s10 = inlined_call_operand.hbm [shape: f32[4,1,32], index: 10, kind: input, shape index: {}]   ;;  %s3452_s11 = inlined_call_operand.hbm [shape: f32[2,32,32], index: 11, kind: input, shape index: {}]   ;;  %s3453_s12 = inlined_call_operand.hbm [shape: f32[2,1,32], index: 12, kind: input, shape index: {}]   ;;  %s3454_s13 = inlined_call_operand.hbm [shape: f32[2,1,1], index: 13, kind: input, shape index: {}]   ;;  %s3455_s14 = inlined_call_operand.hbm [shape: f32[2,16,32], index: 14, kind: output, shape index: {}]   ;;  %s3456_s1 = inlined_call_operand.hbm [shape: s32[3], index: 1, kind: input, shape index: {}]  }
   0x1   :  { %3486 = sst [smem:[#allocation42_spill]] %s3443_s2  ;;  %s2251_s15 = scalar_lea.hbm %s3442_s0, 16 }
   0x2   :  { %3487 = sst [smem:[#allocation43_spill]] %s3444_s3  ;;  %p2252_p0 = scmp.ne.s32.totalorder %s3442_s0, %s2251_s15 }
   0x3   :  { %3488 = sst [smem:[#allocation44_spill]] %s3446_s5  ;;  %p2255_p1 = scmp.lt.u32.totalorder %s2251_s15, %s3442_s0 }
   0x4   :  { %3489 = sst [smem:[#allocation45_spill]] %s3447_s6 }
   0x5   :  { %3490 = sst [smem:[#allocation46_spill]] %s3448_s7  ;;  %p2257_p2 = pnand %p2255_p1, %p2252_p0 }
   0x6   :  { %3491 = sst [smem:[#allocation47_spill]] %s3449_s8 }
   0x7   :  { %3492 = sst [smem:[#allocation48_spill]] %s3450_s9 }
   0x8   :  { %3493 = sst [smem:[#allocation49_spill]] %s3452_s11 }
   0x9   :  { %3494 = sst [smem:[#allocation50_spill]] %s3455_s14 }
   0xa   :  { %2260 = shalt.err (!%p2257_p2)  }
   0xb   :  { %s2713_s20 = smov [#allocation5]   ;;  %s2261_s25 = scalar_lea.hbm %s3456_s1, 16 }
   0xc   :  { %20 = dma.hbm_to_smem %s3442_s0, 16, %s2713_s20, [#allocation4] }
   0xd   :  { %p2262_p3 = scmp.ne.s32.totalorder %s3456_s1, %s2261_s25  ;;  %p2265_p4 = scmp.lt.u32.totalorder %s2261_s25, %s3456_s1 }
   0xf   :  { %p2267_p5 = pnand %p2265_p4, %p2262_p3 }
  0x11   :  { %2270 = shalt.err (!%p2267_p5)  }
  0x12   :  { %s2714_s30 = smov [#allocation6]  }
  0x13   :  { %22 = dma.hbm_to_smem %s3456_s1, 16, %s2714_s30, [#allocation4] }
  0x14   :  { %2659 = dma.done.wait [#allocation4], 32 }
  0x15   :  { %2660 = vsyncadd [#allocation4], 4294967264 }
  0x16   :  { %24 = sfence }
  0x17   :  { %25 = vsyncpa [#allocation8], 0 }
  0x18   :  { %26 = vsyncpa [#allocation11], 0 }
  0x19   :  { %28 = vsyncpa [#allocation11 + $0x1], 0 }
  0x1a   :  { %29 = vsyncpa [#allocation14], 0 }
  0x1b   :  { %31 = vsyncpa [#allocation14 + $0x1], 0 }
  0x1c   :  { %32 = vsyncpa [#allocation17], 0 }
  0x1d   :  { %34 = vsyncpa [#allocation17 + $0x1], 0 }
  0x1e   :  { %35 = vsyncpa [#allocation20], 0 }
  0x1f   :  { %36 = vsyncpa [#allocation23], 0 }
  0x20   :  { %37 = vsyncpa [#allocation26], 0 }
  0x21   :  { %38 = vsyncpa [#allocation9], 0  ;;  %s2840_s0 = smov 0   ;;  %s2842_s17 = smov 0  }
  0x22   :  { %s2844_s18 = smov 0   ;;  %s2846_s1 = smov 0  }
  0x23 LB: > { %3495 = sst [smem:[#allocation38_spill]] %s2707_s18  ;;  %s2861_s19 = sadd.s32 4294967295, %s2711_s1   ;;  %s2711_s1 = sphi %s2846_s1, %s3544_s1   ;;  %s2707_s18 = sphi %s2844_s18, %s3546_s18   ;;  %s2703_s17 = sphi %s2842_s17, %s3548_s17   ;;  %s2699_s0 = sphi %s2840_s0, %s3547_s0  }
  0x24   : > { %p1834_p6 = scmp.ge.s32.totalorder %s2711_s1, 1  ;;  %p3463_p7 = scmp.eq.s32.totalorder %s2861_s19, 0 }
  0x25   : > { %p347_p8 = scmp.lt.s32.totalorder %s2711_s1, 4  ;;  %s2715_s21 = smov [#allocation18]  }
  0x26   : > { %s372_s22 = sshll.u32 %s2715_s21, 4  ;;  %s2716_s23 = smov [#allocation19]   ;;  %s2871_s22 = int_to_ptr.vmem [resolvable:$true] %s372_s22 }
  0x27   : > { %p2867_p10 = pnand %p1834_p6, %p347_p8  ;;  %s385_s24 = sshll.u32 %s2716_s23, 4  ;;  %s2881_s24 = int_to_ptr.vmem [resolvable:$true] %s385_s24 }
  0x28   : > { %s2717_s26 = smov [#allocation22]   ;;  %s3499_s8 = sld [smem:[#allocation47_spill]] }
  0x29   : > { %s3496_s20 = scalar_select %p2867_p10, 1, 0 }
  0x2a   : > { %p2097_p11 = pneg %p2867_p10  ;;  %s2883_s27 = sshll.u32 %s2717_s26, 4  ;;  %s412_s27 = int_to_ptr.vmem [resolvable:$true] %s2883_s27 }
  0x2b   : > { %3497 = sst [smem:[#allocation39_spill]] %s3496_s20 }
  0x2c   : > { %p2877_p12 = pnand %p2097_p11, %p3463_p7 }
  0x2e   : > { %s3498_s25 = scalar_select %p2877_p12, 1, 0 }
  0x2f   : > { %s2271_s30 = scalar_lea.hbm %s3499_s8, 512  ;;  %p2893_p0 = pneg %p2877_p12 }
  0x30   : > { %p2272_p13 = scmp.ne.s32.totalorder %s3499_s8, %s2271_s30  ;;  %p2278_p3 = scmp.lt.u32.totalorder %s2271_s30, %s3499_s8 }
  0x31   : > { %s3500_s21 = scalar_select %p2893_p0, 1, 0 }
  0x32   : > { %p2274_p1 = pnand %p2893_p0, %p2272_p13 }
  0x34   : > { %p2275_p2 = pneg %p2274_p1 }
  0x36   : > { %p2280_p4 = pnand %p2278_p3, %p2275_p2 }
  0x38   : > { %2283 = shalt.err (!%p2280_p4)
}
  0x39   : > { %s2284_s28 = scalar_lea.vmem %s2871_s22, 512  ;;  %p2292_p11 = scmp.lt.s32.totalorder %s2871_s22, %s2871_s22 }
  0x3a   : > { %p2285_p5 = scmp.ne.s32.totalorder %s2871_s22, %s2284_s28  ;;  %p2293_p9 = scmp.lt.s32.totalorder %s2284_s28, %s2284_s28 }
  0x3c   : > { %p2287_p6 = pnand %p2285_p5, %p2893_p0  ;;  %p2294_p13 = por %p2293_p9, %p2292_p11 }
  0x3e   : > { %p2288_p8 = pneg %p2287_p6 }
  0x40   : > { %p2295_p1 = pnand %p2294_p13, %p2288_p8 }
  0x42   : > { %2298 = shalt.err (!%p2295_p1)
}
  0x43   : > { %s3461_s29 = smov 64   ;;  %s3469_s30 = smov 4  }
  0x44   : > { %2103 = dma.hbm_to_vmem [thread:$0]  (!%p2877_p12), %s3499_s8, 512, %s2871_s22, [#allocation17], %s3461_s29, %s3461_s29, %s3469_s30  }
  0x45   : > { %s3501_s9 = sld [smem:[#allocation48_spill]] }
  0x4b   : > { %s2299_s28 = scalar_lea.hbm %s3501_s9, 32 }
  0x4c   : > { %p2300_p9 = scmp.ne.s32.totalorder %s3501_s9, %s2299_s28  ;;  %p2306_p4 = scmp.lt.u32.totalorder %s2299_s28, %s3501_s9 }
  0x4e   : > { %p2302_p2 = pnand %p2300_p9, %p2893_p0 }
  0x50   : > { %p2303_p3 = pneg %p2302_p2 }
  0x52   : > { %p2308_p5 = pnand %p2306_p4, %p2303_p3 }
  0x54   : > { %2311 = shalt.err (!%p2308_p5)
}
  0x55   : > { %s2312_s22 = scalar_lea.vmem %s2881_s24, 32  ;;  %p2320_p13 = scmp.lt.s32.totalorder %s2881_s24, %s2881_s24 }
  0x56   : > { %p2313_p6 = scmp.ne.s32.totalorder %s2881_s24, %s2312_s22  ;;  %p2321_p1 = scmp.lt.s32.totalorder %s2312_s22, %s2312_s22 }
  0x58   : > { %p2315_p8 = pnand %p2313_p6, %p2893_p0  ;;  %p2322_p9 = por %p2321_p1, %p2320_p13 }
  0x5a   : > { %p2316_p11 = pneg %p2315_p8 }
  0x5c   : > { %p2323_p2 = pnand %p2322_p9, %p2316_p11 }
  0x5e   : > { %2326 = shalt.err (!%p2323_p2)
}
  0x5f   : > { %s3465_s14 = smov 16   ;;  %s3467_s6 = smov 1  }
  0x60   : > { %2106 = dma.hbm_to_vmem [thread:$0]  (!%p2877_p12), %s3501_s9, 32, %s2881_s24, [#allocation20], %s3465_s14, %s3465_s14, %s3467_s6  }
  0x61   : > { %s3502_s11 = sld [smem:[#allocation49_spill]] }
  0x67   : > { %s2327_s23 = scalar_lea.hbm %s3502_s11, 1024 }
  0x68   : > { %p2328_p3 = scmp.ne.s32.totalorder %s3502_s11, %s2327_s23  ;;  %p2334_p6 = scmp.lt.u32.totalorder %s2327_s23, %s3502_s11 }
  0x6a   : > { %p2330_p4 = pnand %p2328_p3, %p2893_p0 }
  0x6c   : > { %p2331_p5 = pneg %p2330_p4 }
  0x6e   : > { %p2336_p8 = pnand %p2334_p6, %p2331_p5 }
  0x70   : > { %2339 = shalt.err (!%p2336_p8)
}
  0x71   : > { %s2340_s7 = scalar_lea.vmem %s412_s27, 1024  ;;  %p2348_p9 = scmp.lt.s32.totalorder %s412_s27, %s412_s27 }
  0x72   : > { %p2341_p11 = scmp.ne.s32.totalorder %s412_s27, %s2340_s7  ;;  %p2349_p2 = scmp.lt.s32.totalorder %s2340_s7, %s2340_s7 }
  0x74   : > { %p2343_p13 = pnand %p2341_p11, %p2893_p0  ;;  %p2350_p7 = por %p2349_p2, %p2348_p9 }
  0x76   : > { %p2344_p1 = pneg %p2343_p13 }
  0x78   : > { %p2351_p10 = pnand %p2350_p7, %p2344_p1 }
  0x7a   : > { %2354 = shalt.err (!%p2351_p10)
}
  0x7b   : > { %s2722_s24 = smov 128   ;;  %s2723_s29 = smov 8  }
  0x7c   : > { %2112 = dma.hbm_to_vmem [thread:$0]  (!%p2877_p12), %s3502_s11, 1024, %s412_s27, [#allocation23], %s2722_s24, %s2722_s24, %s2723_s29  }
  0x7d   : > { %s2963_s16 = sadd.s32 1, %s2711_s1   ;;  %s72_s26 = sadd.s32 1, %s2707_s18 }
  0x7e   : > { %3503 = sst [smem:[#allocation40_spill]] %s2963_s16  ;;  %s69_s23 = ssub.s32 %s2711_s1, %s2963_s16 }
  0x7f   : > { %p70_p7 = scmp.eq.s32.totalorder %s69_s23, 0  ;;  %p79_p10 = scmp.ne.s32.totalorder %s2707_s18, %s2703_s17 }
  0x80   : > { %p80_p3 = scmp.eq.s32.totalorder %s2711_s1, 0  ;;  %p85_p4 = scmp.ne.s32.totalorder %s2703_s17, %s2699_s0 }
  0x81   : > { %s2974_s28 = scalar_select %p70_p7, %s2707_s18, %s72_s26  }
  0x82   : > { %p81_p5 = por %p80_p3, %p79_p10  ;;  %p3505_p6 = scmp.eq.s32.totalorder %s2861_s19, 0 }
  0x83   : > { %3504 = sst [smem:[#allocation41_spill]] %s2974_s28  ;;  %p2142_p11 = scmp.lt.s32.totalorder %s2711_s1, 3 }
  0x84   : > { %p2978_p8 = por %p3505_p6, %p85_p4  ;;  %s2984_s7 = sand.u32 1, %s2711_s1  }
  0x85   : > { %s2987_s27 = sand.u32 1, %s2707_s18   ;;  %s1913_s29 = sshll.u32 %s2711_s1, 7 }
  0x86   : > { %s3506_s22 = scalar_select %p2978_p8, 1, 0 }
  0x87   : > { %s1843_s24 = sshll.u32 %s2987_s27, 3  ;;  %s3507_s3 = sld [smem:[#allocation43_spill]] }
  0x88   : > { %s455_s23 = scalar_lea.vmem [#allocation10], %s1843_s24  ;;  %p2996_p13 = pnand %p2142_p11, %p81_p5 }
  0x89   : > { %s462_s26 = sshll.u32 %s455_s23, 4  ;;  %s3000_s26 = int_to_ptr.vmem [resolvable:$true] %s462_s26 }
  0x8a   : > { %s3508_s14 = scalar_select %p2996_p13, 1, 0 }
  0x8b   : > { %p3007_p9 = pneg %p2996_p13 }
  0x8d   : > { %s2994_s0 = scalar_lea.hbm %s3507_s3, %s1913_s29  ;;  %s2360_s15 = scalar_lea.hbm %s3507_s3, 384 }
  0x8e   : > { %s2355_s30 = scalar_lea.hbm %s2994_s0, 128  ;;  %p2361_p10 = scmp.lt.u32.totalorder %s2994_s0, %s3507_s3 }
  0x8f   : > { %p2356_p1 = scmp.ne.s32.totalorder %s2994_s0, %s2355_s30  ;;  %p2362_p3 = scmp.lt.u32.totalorder %s2360_s15, %s2355_s30 }
  0x90   : > { %s3509_s29 = scalar_select %p3007_p9, 1, 0 }
  0x91   : > { %p2358_p2 = pnand %p3007_p9, %p2356_p1  ;;  %p2363_p4 = por %p2362_p3, %p2361_p10 }
  0x92   : > { %p2364_p5 = scmp.lt.u32.totalorder %s2355_s30, %s2994_s0 }
  0x93   : > { %p2359_p7 = pneg %p2358_p2 }
  0x94   : > { %p2365_p6 = por %p2364_p5, %p2363_p4 }
  0x96   : > { %p2366_p11 = pnand %p2365_p6, %p2359_p7 }
  0x98   : > { %2369 = shalt.err (!%p2366_p11)
}
  0x99   : > { %s2370_s6 = scalar_lea.vmem %s3000_s26, 128  ;;  %s2724_s24 = smov [#allocation10]  }
  0x9a   : > { %p2371_p1 = scmp.ne.s32.totalorder %s3000_s26, %s2370_s6  ;;  %s2375_s20 = sshll.u32 %s2724_s24, 4  ;;  %s2376_s20 = int_to_ptr.vmem [resolvable:$false] %s2375_s20 }
  0x9b   : > { %s2377_s8 = scalar_lea.vmem %s2376_s20, 256  ;;  %p2378_p12 = scmp.lt.s32.totalorder %s3000_s26, %s2376_s20 }
  0x9c   : > { %p2373_p2 = pnand %p2371_p1, %p3007_p9  ;;  %p2379_p0 = scmp.lt.s32.totalorder %s2377_s8, %s2370_s6 }
  0x9e   : > { %p2374_p8 = pneg %p2373_p2  ;;  %p2380_p10 = por %p2379_p0, %p2378_p12 }
  0xa0   : > { %p2381_p3 = pnand %p2380_p10, %p2374_p8 }
  0xa2   : > { %2384 = shalt.err (!%p2381_p3)
}
  0xa3   : > { %s3510_s30 = smov 4   ;;  %s3511_s15 = smov 64  }
  0xa4   : > { %s3512_s23 = scalar_lea.sflag [#allocation11], %s2984_s7  ;;  %s3477_s24 = sshll.u32 %s2711_s1, 4 }
  0xa5   : > { %2122 = dma.hbm_to_vmem [thread:$0]  (!%p2996_p13), %s2994_s0, 128, %s3000_s26, %s3512_s23, %s3511_s15, %s3511_s15, %s3510_s30  }
  0xa6   : > { %s496_s6 = scalar_lea.vmem [#allocation13], %s2987_s27  ;;  %s3513_s5 = sld [smem:[#allocation44_spill]] }
  0xa7   : > { %s503_s20 = sshll.u32 %s496_s6, 4  ;;  %s3484_s11 = scalar_lea.sflag [#allocation14], %s2984_s7  ;;  %s504_s20 = int_to_ptr.vmem [resolvable:$true] %s503_s20 }
  0xac   : > { %s3042_s9 = scalar_lea.hbm %s3513_s5, %s3477_s24  ;;  %s2390_s23 = scalar_lea.hbm %s3513_s5, 48 }
  0xad   : > { %s2385_s28 = scalar_lea.hbm %s3042_s9, 16  ;;  %p2391_p7 = scmp.lt.u32.totalorder %s3042_s9, %s3513_s5 }
  0xae   : > { %p2386_p12 = scmp.ne.s32.totalorder %s3042_s9, %s2385_s28  ;;  %p2392_p4 = scmp.lt.u32.totalorder %s2390_s23, %s2385_s28 }
  0xaf   : > { %p2394_p6 = scmp.lt.u32.totalorder %s2385_s28, %s3042_s9 }
  0xb0   : > { %p2388_p0 = pnand %p2386_p12, %p3007_p9  ;;  %p2393_p5 = por %p2392_p4, %p2391_p7 }
  0xb2   : > { %p2389_p8 = pneg %p2388_p0  ;;  %p2395_p11 = por %p2394_p6, %p2393_p5 }
  0xb4   : > { %p2396_p1 = pnand %p2395_p11, %p2389_p8 }
  0xb6   : > { %2399 = shalt.err (!%p2396_p1)
}
  0xb7   : > { %s2400_s3 = scalar_lea.vmem %s504_s20, 16  ;;  %s2725_s8 = smov [#allocation13]  }
  0xb8   : > { %p2401_p2 = scmp.ne.s32.totalorder %s504_s20, %s2400_s3  ;;  %s2405_s24 = sshll.u32 %s2725_s8, 4  ;;  %s2406_s24 = int_to_ptr.vmem [resolvable:$false] %s2405_s24 }
  0xb9   : > { %s2407_s0 = scalar_lea.vmem %s2406_s24, 32  ;;  %p2408_p12 = scmp.lt.s32.totalorder %s504_s20, %s2406_s24 }
  0xba   : > { %p2403_p10 = pnand %p2401_p2, %p3007_p9  ;;  %p2409_p0 = scmp.lt.s32.totalorder %s2407_s0, %s2400_s3 }
  0xbc   : > { %p2404_p3 = pneg %p2403_p10  ;;  %p2410_p13 = por %p2409_p0, %p2408_p12 }
  0xbe   : > { %p2411_p4 = pnand %p2410_p13, %p2404_p3 }
  0xc0   : > { %2414 = shalt.err (!%p2411_p4)
}
  0xc1   : > { %p3514_p7 = scmp.ne.s32.totalorder %s3508_s14, 0  ;;  %s2726_s18 = smov [#allocation7]  }
  0xc2   : > { %s359_s28 = sshll.u32 %s2726_s18, 4  ;;  %s2727_s26 = smov [#allocation21]   ;;  %s360_s28 = int_to_ptr.vmem [resolvable:$true] %s359_s28 }
  0xc3   : > { %2128 = dma.hbm_to_vmem [thread:$0]  (!%p3514_p7), %s3042_s9, 16, %s504_s20, %s3484_s11  }
  0xc4   : > { %s398_s23 = sshll.u32 %s2727_s26, 4  ;;  %s3515_s2 = sld [smem:[#allocation42_spill]]  ;;  %s399_s23 = int_to_ptr.vmem [resolvable:$true] %s398_s23 }
  0xc5   : > { %p3516_p8 = scmp.ne.s32.totalorder %s3500_s21, 0 }
  0xca   : > { %s2415_s24 = scalar_lea.hbm %s3515_s2, 256 }
  0xcb   : > { %p2416_p13 = scmp.ne.s32.totalorder %s3515_s2, %s2415_s24  ;;  %p2422_p11 = scmp.lt.u32.totalorder %s2415_s24, %s3515_s2 }
  0xcd   : > { %p2418_p5 = pnand %p2416_p13, %p3516_p8 }
  0xcf   : > { %p2419_p6 = pneg %p2418_p5 }
  0xd1   : > { %p2424_p1 = pnand %p2422_p11, %p2419_p6 }
  0xd3   : > { %2427 = shalt.err (!%p2424_p1)
}
  0xd4   : > { %s2428_s9 = scalar_lea.vmem %s360_s28, 256  ;;  %p2436_p12 = scmp.lt.s32.totalorder %s360_s28, %s360_s28 }
  0xd5   : > { %p2429_p2 = scmp.ne.s32.totalorder %s360_s28, %s2428_s9  ;;  %p2437_p0 = scmp.lt.s32.totalorder %s2428_s9, %s2428_s9 }
  0xd7   : > { %p2431_p10 = pnand %p2429_p2, %p3516_p8  ;;  %p2438_p4 = por %p2437_p0, %p2436_p12 }
  0xd9   : > { %p2432_p3 = pneg %p2431_p10 }
  0xdb   : > { %p2439_p7 = pnand %p2438_p4, %p2432_p3 }
  0xdd   : > { %2442 = shalt.err (!%p2439_p7)
}
  0xde   : > { %p3517_p13 = scmp.ne.s32.totalorder %s3498_s25, 0  ;;  %s2443_s26 = scalar_lea.hbm %s3451_s10, 64 }
  0xdf   : > { %p2444_p5 = scmp.ne.s32.totalorder %s3451_s10, %s2443_s26  ;;  %p2450_p11 = scmp.lt.u32.totalorder %s2443_s26, %s3451_s10 }
  0xe0   : > { %2100 = dma.hbm_to_vmem [thread:$0]  (!%p3517_p13), %s3515_s2, 256, %s360_s28, [#allocation8], %s3511_s15, %s3511_s15, %s3510_s30  }
  0xe1   : > { %p2446_p7 = pnand %p2444_p5, %p3516_p8 }
  0xe3   : > { %p2447_p6 = pneg %p2446_p7 }
  0xe5   : > { %p2452_p1 = pnand %p2450_p11, %p2447_p6 }
  0xe7   : > { %2455 = shalt.err (!%p2452_p1)
}
  0xe8   : > { %s2456_s0 = scalar_lea.vmem %s399_s23, 64  ;;  %p2464_p12 = scmp.lt.s32.totalorder %s399_s23, %s399_s23 }
  0xe9   : > { %p2457_p2 = scmp.ne.s32.totalorder %s399_s23, %s2456_s0  ;;  %p2465_p0 = scmp.lt.s32.totalorder %s2456_s0, %s2456_s0 }
  0xeb   : > { %p2459_p10 = pnand %p2457_p2, %p3516_p8  ;;  %p2466_p4 = por %p2465_p0, %p2464_p12 }
  0xed   : > { %p2460_p3 = pneg %p2459_p10 }
  0xef   : > { %p2467_p9 = pnand %p2466_p4, %p2460_p3 }
  0xf1   : > { %2470 = shalt.err (!%p2467_p9)
}
  0xf2   : > { %s3518_s28 = smov 1   ;;  %s3519_s9 = smov 16  }
  0xf3   : > { %2109 = dma.hbm_to_vmem [thread:$0]  (!%p3517_p13), %s3451_s10, 64, %s399_s23, [#allocation20], %s3519_s9, %s3519_s9, %s3518_s28  }
  0xf4   : > { %s2728_s20 = smov [#allocation24]   ;;  %s2729_s26 = smov [#allocation25]  }
  0xf5   : > { %s424_s18 = sshll.u32 %s2728_s20, 4  ;;  %s437_s6 = sshll.u32 %s2729_s26, 4  ;;  %s425_s18 = int_to_ptr.vmem [resolvable:$true] %s424_s18  ;;  %s438_s6 = int_to_ptr.vmem [resolvable:$true] %s437_s6 }
  0xf6   : > { %s2471_s3 = scalar_lea.hbm %s3453_s12, 32 }
  0xf7   : > { %p2472_p9 = scmp.ne.s32.totalorder %s3453_s12, %s2471_s3  ;;  %p2478_p6 = scmp.lt.u32.totalorder %s2471_s3, %s3453_s12 }
  0xf9   : > { %p2474_p5 = pnand %p2472_p9, %p3516_p8 }
  0xfb   : > { %p2475_p7 = pneg %p2474_p5 }
  0xfd   : > { %p2480_p11 = pnand %p2478_p6, %p2475_p7 }
  0xff   : > { %2483 = shalt.err (!%p2480_p11)
}
 0x100   : > { %s2484_s23 = scalar_lea.vmem %s425_s18, 32  ;;  %p2492_p3 = scmp.lt.s32.totalorder %s425_s18, %s425_s18 }
 0x101   : > { %p2485_p1 = scmp.ne.s32.totalorder %s425_s18, %s2484_s23  ;;  %p2493_p12 = scmp.lt.s32.totalorder %s2484_s23, %s2484_s23 }
 0x103   : > { %p2487_p2 = pnand %p2485_p1, %p3516_p8  ;;  %p2494_p0 = por %p2493_p12, %p2492_p3 }
 0x105   : > { %p2488_p10 = pneg %p2487_p2 }
 0x107   : > { %p2495_p4 = pnand %p2494_p0, %p2488_p10 }
 0x109   : > { %2498 = shalt.err (!%p2495_p4)
}
 0x10a   : > { %2115 = dma.hbm_to_vmem [thread:$0]  (!%p3517_p13), %s3453_s12, 32, %s425_s18, [#allocation23], %s3519_s9, %s3519_s9, %s3518_s28  }
 0x10b   : > { %s1846_s16 = sshll.u32 %s2987_s27, 4  ;;  %s2499_s8 = scalar_lea.hbm %s3454_s13, 32 }
 0x10c   : > { %p2500_p9 = scmp.ne.s32.totalorder %s3454_s13, %s2499_s8  ;;  %p2506_p6 = scmp.lt.u32.totalorder %s2499_s8, %s3454_s13 }
 0x10e   : > { %p2502_p5 = pnand %p2500_p9, %p3516_p8 }
 0x110   : > { %p2503_p7 = pneg %p2502_p5 }
 0x112   : > { %p2508_p11 = pnand %p2506_p6, %p2503_p7 }
 0x114   : > { %2511 = shalt.err (!%p2508_p11)
}
 0x115   : > { %s2512_s18 = scalar_lea.vmem %s438_s6, 32  ;;  %p2520_p3 = scmp.lt.s32.totalorder %s438_s6, %s438_s6 }
 0x116   : > { %p2513_p1 = scmp.ne.s32.totalorder %s438_s6, %s2512_s18  ;;  %p2521_p12 = scmp.lt.s32.totalorder %s2512_s18, %s2512_s18 }
 0x118   : > { %p2515_p2 = pnand %p2513_p1, %p3516_p8  ;;  %p2522_p0 = por %p2521_p12, %p2520_p3 }
 0x11a   : > { %p2516_p10 = pneg %p2515_p2 }
 0x11c   : > { %p2523_p4 = pnand %p2522_p0, %p2516_p10 }
 0x11e   : > { %2526 = shalt.err (!%p2523_p4)
}
 0x11f   : > { %2118 = dma.hbm_to_vmem [thread:$0]  (!%p3517_p13), %s3454_s13, 32, %s438_s6, [#allocation26], %s3519_s9, %s3519_s9, %s3518_s28  }
 0x120   : > { %s1914_s21 = sshll.u32 %s2711_s1, 8  ;;  %s476_s25 = scalar_lea.vmem [#allocation12], %s1846_s16 }
 0x121   : > { %s3155_s26 = scalar_lea.hbm %s3445_s4, %s1914_s21  ;;  %s483_s8 = sshll.u32 %s476_s25, 4  ;;  %s3159_s8 = int_to_ptr.vmem [resolvable:$true] %s483_s8 }
 0x122   : > { %s2527_s24 = scalar_lea.hbm %s3155_s26, 256  ;;  %p3520_p9 = scmp.ne.s32.totalorder %s3509_s29, 0 }
 0x123   : > { %p2528_p8 = scmp.ne.s32.totalorder %s3155_s26, %s2527_s24  ;;  %s2532_s6 = scalar_lea.hbm %s3445_s4, 768 }
 0x124   : > { %p2533_p7 = scmp.lt.u32.totalorder %s3155_s26, %s3445_s4  ;;  %p2534_p6 = scmp.lt.u32.totalorder %s2532_s6, %s2527_s24 }
 0x125   : > { %p2530_p13 = pnand %p2528_p8, %p3520_p9  ;;  %p2536_p1 = scmp.lt.u32.totalorder %s2527_s24, %s3155_s26 }
 0x126   : > { %p2535_p11 = por %p2534_p6, %p2533_p7 }
 0x127   : > { %p2531_p5 = pneg %p2530_p13 }
 0x128   : > { %p2537_p2 = por %p2536_p1, %p2535_p11 }
 0x12a   : > { %p2538_p10 = pnand %p2537_p2, %p2531_p5 }
 0x12c   : > { %2541 = shalt.err (!%p2538_p10)
}
 0x12d   : > { %s2542_s5 = scalar_lea.vmem %s3159_s8, 256  ;;  %s2730_s18 = smov [#allocation12]  }
 0x12e   : > { %p2543_p3 = scmp.ne.s32.totalorder %s3159_s8, %s2542_s5  ;;  %s2547_s23 = sshll.u32 %s2730_s18, 4  ;;  %s2548_s23 = int_to_ptr.vmem [resolvable:$false] %s2547_s23 }
 0x12f   : > { %s2549_s2 = scalar_lea.vmem %s2548_s23, 512  ;;  %p2550_p4 = scmp.lt.s32.totalorder %s3159_s8, %s2548_s23 }
 0x130   : > { %p2545_p12 = pnand %p2543_p3, %p3520_p9  ;;  %p2551_p8 = scmp.lt.s32.totalorder %s2549_s2, %s2542_s5 }
 0x132   : > { %p2546_p0 = pneg %p2545_p12  ;;  %p2552_p13 = por %p2551_p8, %p2550_p4 }
 0x134   : > { %p2553_p7 = pnand %p2552_p13, %p2546_p0 }
 0x136   : > { %2556 = shalt.err (!%p2553_p7)
}
 0x137   : > { %p3521_p5 = scmp.ne.s32.totalorder %s3508_s14, 0  ;;  %s3522_s11 = scalar_lea.sflag [#allocation11], %s2984_s7 }
 0x138   : > { %s3523_s24 = sld [smem:[#allocation45_spill]]  ;;  %s514_s9 = scalar_lea.vmem [#allocation15], %s1846_s16 }
 0x139   : > { %2125 = dma.hbm_to_vmem [thread:$0]  (!%p3521_p5), %s3155_s26, 256, %s3159_s8, %s3522_s11, %s3511_s15, %s3511_s15, %s3510_s30  }
 0x13a   : > { %s521_s6 = sshll.u32 %s514_s9, 4  ;;  %s3524_s3 = sshll.u32 %s2711_s1, 4  ;;  %s3203_s6 = int_to_ptr.vmem [resolvable:$true] %s521_s6 }
 0x13b   : > { %s3525_s18 = sld [smem:[#allocation46_spill]] }
 0x13e   : > { %s3192_s28 = scalar_lea.hbm %s3523_s24, %s1914_s21  ;;  %s2562_s11 = scalar_lea.hbm %s3523_s24, 768 }
 0x13f   : > { %s2557_s26 = scalar_lea.hbm %s3192_s28, 256  ;;  %p2563_p2 = scmp.lt.u32.totalorder %s3192_s28, %s3523_s24 }
 0x140   : > { %p2558_p6 = scmp.ne.s32.totalorder %s3192_s28, %s2557_s26  ;;  %p2564_p10 = scmp.lt.u32.totalorder %s2562_s11, %s2557_s26 }
 0x141   : > { %s3526_s23 = smov %s3525_s18  ;;  %s3201_s2 = scalar_lea.hbm %s3525_s18, %s3524_s3 }
 0x142   : > { %p2560_p11 = pnand %p2558_p6, %p3520_p9  ;;  %p2565_p3 = por %p2564_p10, %p2563_p2 }
 0x143   : > { %p2566_p12 = scmp.lt.u32.totalorder %s2557_s26, %s3192_s28 }
 0x144   : > { %p2561_p1 = pneg %p2560_p11 }
 0x145   : > { %p2567_p0 = por %p2566_p12, %p2565_p3 }
 0x147   : > { %p2568_p4 = pnand %p2567_p0, %p2561_p1 }
 0x149   : > { %2571 = shalt.err (!%p2568_p4)
}
 0x14a   : > { %s2572_s1 = scalar_lea.vmem %s3203_s6, 256  ;;  %s2731_s25 = smov [#allocation15]  }
 0x14b   : > { %p2573_p8 = scmp.ne.s32.totalorder %s3203_s6, %s2572_s1  ;;  %s2577_s9 = sshll.u32 %s2731_s25, 4  ;;  %s2578_s9 = int_to_ptr.vmem [resolvable:$false] %s2577_s9 }
 0x14c   : > { %s2579_s3 = scalar_lea.vmem %s2578_s9, 512  ;;  %p2580_p6 = scmp.lt.s32.totalorder %s3203_s6, %s2578_s9 }
 0x14d   : > { %p2575_p13 = pnand %p2573_p8, %p3520_p9  ;;  %p2581_p11 = scmp.lt.s32.totalorder %s2579_s3, %s2572_s1 }
 0x14f   : > { %p2576_p7 = pneg %p2575_p13  ;;  %p2582_p2 = por %p2581_p11, %p2580_p6 }
 0x151   : > { %p2583_p10 = pnand %p2582_p2, %p2576_p7 }
 0x153   : > { %2586 = shalt.err (!%p2583_p10)
}
 0x154   : > { %s3527_s0 = scalar_lea.sflag [#allocation14], %s2984_s7  ;;  %s534_s5 = scalar_lea.vmem [#allocation16], %s2987_s27 }
 0x155   : > { %2131 = dma.hbm_to_vmem [thread:$0]  (!%p3521_p5), %s3192_s28, 256, %s3203_s6, %s3527_s0, %s3511_s15, %s3511_s15, %s3510_s30  }
 0x156   : > { %s541_s18 = sshll.u32 %s534_s5, 4  ;;  %s532_s26 = scalar_lea.sflag [#allocation17], %s2984_s7  ;;  %s542_s18 = int_to_ptr.vmem [resolvable:$true] %s541_s18 }
 0x157   : > { %s2587_s21 = scalar_lea.hbm %s3201_s2, 16  ;;  %s2592_s20 = scalar_lea.hbm %s3526_s23, 48 }
 0x158   : > { %p2588_p1 = scmp.ne.s32.totalorder %s3201_s2, %s2587_s21  ;;  %p2593_p0 = scmp.lt.u32.totalorder %s3201_s2, %s3526_s23 }
 0x159   : > { %p2594_p4 = scmp.lt.u32.totalorder %s2592_s20, %s2587_s21  ;;  %p2596_p13 = scmp.lt.u32.totalorder %s2587_s21, %s3201_s2 }
 0x15a   : > { %p2590_p3 = pnand %p2588_p1, %p3520_p9 }
 0x15b   : > { %p2595_p8 = por %p2594_p4, %p2593_p0 }
 0x15c   : > { %p2591_p12 = pneg %p2590_p3 }
 0x15d   : > { %p2597_p7 = por %p2596_p13, %p2595_p8 }
 0x15f   : > { %p2598_p6 = pnand %p2597_p7, %p2591_p12 }
 0x161   : > { %2601 = shalt.err (!%p2598_p6)
}
 0x162   : > { %s2602_s7 = scalar_lea.vmem %s542_s18, 16  ;;  %s2732_s27 = smov [#allocation16]  }
 0x163   : > { %p2603_p11 = scmp.ne.s32.totalorder %s542_s18, %s2602_s7  ;;  %s2607_s30 = sshll.u32 %s2732_s27, 4  ;;  %s2608_s30 = int_to_ptr.vmem [resolvable:$false] %s2607_s30 }
 0x164   : > { %s2609_s15 = scalar_lea.vmem %s2608_s30, 32  ;;  %p2610_p1 = scmp.lt.s32.totalorder %s542_s18, %s2608_s30 }
 0x165   : > { %p2605_p2 = pnand %p2603_p11, %p3520_p9  ;;  %p2611_p3 = scmp.lt.s32.totalorder %s2609_s15, %s2602_s7 }
 0x167   : > { %p2606_p10 = pneg %p2605_p2  ;;  %p2612_p5 = por %p2611_p3, %p2610_p1 }
 0x169   : > { %p2613_p0 = pnand %p2612_p5, %p2606_p10 }
 0x16b   : > { %2616 = shalt.err (!%p2613_p0)
}
 0x16c   : > { %p3528_p4 = scmp.ne.s32.totalorder %s3508_s14, 0  ;;  %s3529_s28 = sld [smem:[#allocation39_spill]] }
 0x16e   : > { %2134 = dma.hbm_to_vmem [thread:$0]  (!%p3528_p4), %s3201_s2, 16, %s542_s18, %s532_s26  }
 0x172   : > { %p3530_p12 = scmp.ne.s32.totalorder %s3529_s28, 0 }
 0x173   : > { %p3531_p8 = scmp.eq.s32.totalorder (!%p3530_p12), %s2861_s19, 0 }
 0x174   : > { %550 = sbr.rel (%p3530_p12) target bundleno = 1905 (0x771), region = 68 }
 0x17b   : > { %2662 = dma.done.wait (%p3531_p8), [#allocation8], 256   ;;  %p3532_p9 = pmov %p3531_p8 }
 0x17c   : > { %s556_s29 = sand.u32 1, %s2861_s19   ;;  %s3258_s6 = sand.u32 1, %s2703_s17  }
 0x17d   : > { %2664 = vsyncadd (%p3532_p9), [#allocation8], 4294967040  ;;  %s1856_s25 = sshll.u32 %s3258_s6, 3  ;;  %s557_s14 = scalar_lea.sflag [#allocation11], %s556_s29 }
 0x17e   : > { %s3261_s9 = scalar_lea.vmem [#allocation10], %s1856_s25  ;;  %p3533_p5 = scmp.ne.s32.totalorder %s3506_s22, 0 }
 0x180   : > { %2666 = dma.done.wait (%p3533_p5), %s557_s14, 384  }
 0x181   : > { %2668 = vsyncadd (%p3533_p5), %s557_s14, 4294966912  ;;  %s1857_s2 = sshll.u32 %s3258_s6, 4  ;;  %s575_s0 = scalar_lea.sflag [#allocation14], %s556_s29 }
 0x182   : > { %s3268_s3 = scalar_lea.vmem [#allocation12], %s1857_s2  ;;  %s577_s5 = scalar_lea.vmem [#allocation13], %s3258_s6 }
 0x183   : > { %2670 = dma.done.wait (%p3533_p5), %s575_s0, 272  }
 0x184   : > { %2672 = vsyncadd (%p3533_p5), %s575_s0, 4294967024  ;;  %s3275_s18 = scalar_lea.vmem [#allocation15], %s1857_s2  ;;  %s592_s26 = scalar_lea.sflag [#allocation17], %s556_s29 }
 0x185   : > { %s594_s21 = scalar_lea.vmem [#allocation16], %s3258_s6 }
 0x186   : > { %2674 = dma.done.wait (%p3533_p5), %s592_s26, 16  }
 0x187   : > { %2676 = vsyncadd (%p3533_p5), %s592_s26, 4294967280  ;;  %p3534_p13 = pmov %p3531_p8 }
 0x188   : > { %p3535_p7 = pmov %p3531_p8 }
 0x189   : > { %2678 = dma.done.wait (%p3534_p13), [#allocation17], 512  }
 0x18a   : > { %2680 = vsyncadd (%p3535_p7), [#allocation17], 4294966784  ;;  %p3536_p6 = pmov %p3535_p7 }
 0x18c   : > { %2682 = dma.done.wait (%p3536_p6), [#allocation20], 96   ;;  %p3537_p11 = pmov %p3536_p6 }
 0x18d   : > { %p3538_p2 = pmov %p3536_p6 }
 0x18e   : > { %2684 = vsyncadd (%p3537_p11), [#allocation20], 4294967200 }
 0x18f   : > { %2686 = dma.done.wait (%p3538_p2), [#allocation23], 1056   ;;  %p3539_p10 = pmov %p3538_p2 }
 0x190   : > { %p3540_p1 = pmov %p3538_p2 }
 0x191   : > { %2688 = vsyncadd (%p3539_p10), [#allocation23], 4294966240 }
 0x192   : > { %2690 = dma.done.wait (%p3540_p1), [#allocation26], 32   ;;  %p3541_p3 = pmov %p3540_p1 }
 0x193   : > { %v3298_v0 = vld [vmem:[#allocation21] sm:$0x1]  ;;  %v3300_v1 = vld [vmem:[#allocation21 + $0x1] sm:$0x1]  ;;  %v3302_v2 = vld [vmem:[#allocation21 + $0x2] sm:$0x1] }
 0x194   : > { %2692 = vsyncadd (%p3541_p3), [#allocation26], 4294967264  ;;  %v3304_v3 = vld [vmem:[#allocation21 + $0x3] sm:$0x1]  ;;  %p3542_p0 = scmp.ne.s32.totalorder %s2861_s19, 0 }
 0x195   : > { %v2207_v4 = vld [vmem:[#allocation18] sm:$0xff] (!%p3542_p0)   ;;  %v2733_v5 = vmov (!%p3542_p0), 0.0   ;;  %v2208_v6 = vld [vmem:[#allocation18 + $0x10] sm:$0xff] (!%p3542_p0)   ;;  %v2209_v7 = vld [vmem:[#allocation18 + $0x8] sm:$0xff] (!%p3542_p0)   ;;  %vm2734_vm0 = vmmov (!%p3542_p0), 0   ;;  %vm681_vm1 = vcmask (!%p3542_p0), 261120   ;;  %v764_v11 = vlaneseq (!%p3542_p0) }
 0x196   : > { %680 = sbr.rel (%p3542_p0) target bundleno = 639 (0x27f), region = 120  ;;  %1964 = vmatprep.subr.bf16.mxu0 (!%p3542_p0), %v2733_v5  ;;  %1972 = vmatprep.subr.bf16.mxu1 (!%p3542_p0), %v2733_v5  ;;  %v2210_v8 = vld [vmem:[#allocation18 + $0x18] sm:$0xff] (!%p3542_p0)   ;;  %682 = vst.msk [vmem:[#allocation2] sm:$0xff] (!%p3542_p0), %vm681_vm1, %v2733_v5  ;;  %683 = vst.msk [vmem:[#allocation2 + $0x8] sm:$0xff] (!%p3542_p0), %vm681_vm1, %v2733_v5  ;;  %v2212_v10 = vld [vmem:[#allocation7 + $0x8] sm:$0xff] (!%p3542_p0)  }
 0x197   : > { %1965 = vmatpush3.bf16.msra.mxu0 (!%p3542_p0), %v2207_v4  ;;  %1968 = vmatprep.mubr.msk.bf16.mxu0 (!%p3542_p0), %vm2734_vm0, %v2733_v5  ;;  %684 = vst.msk [vmem:[#allocation2 + $0x10] sm:$0xff] (!%p3542_p0), %vm681_vm1, %v2733_v5  ;;  %685 = vst.msk [vmem:[#allocation2 + $0x18] sm:$0xff] (!%p3542_p0), %vm681_vm1, %v2733_v5  ;;  %v2211_v9 = vld [vmem:[#allocation7] sm:$0xff] (!%p3542_p0)   ;;  %v765_v12 = vshrl.u32 (!%p3542_p0), %v764_v11, 7 }
 0x198   : > { %1973 = vmatpush3.bf16.msra.mxu1 (!%p3542_p0), %v2208_v6  ;;  %1966 = vmatprep.subr.bf16.mxu0 (!%p3542_p0), %v2733_v5  ;;  %v1866_v14 = vld [vmem:[#allocation19] ss:$0 sm:$0xff] (!%p3542_p0)  ;;  %v1871_v15 = vld [vmem:[#allocation19 + $0x1] ss:$0 sm:$0xff] (!%p3542_p0) }
 0x199   : > { %1974 = vmatprep.subr.bf16.mxu1 (!%p3542_p0), %v2733_v5  ;;  %1976 = vmatprep.mubr.msk.bf16.mxu1 (!%p3542_p0), %vm2734_vm0, %v2733_v5  ;;  %v766_v13 = vsub.s32 (!%p3542_p0), 0, %v765_v12 }
 0x19b   : > { %1967 = vmatpush3.bf16.msra.mxu0 (!%p3542_p0), %v2209_v7  ;;  %v767_v17 = vrot.slane (!%p3542_p0), %v3298_v0, %v766_v13  ;;  %v771_v18 = vrot.slane (!%p3542_p0), %v3300_v1, %v766_v13  ;;  %v775_v20 = vrot.slane (!%p3542_p0), %v3302_v2, %v766_v13  ;;  %v779_v21 = vrot.slane (!%p3542_p0), %v3304_v3, %v766_v13 }
 0x19c   : > { %1975 = vmatpush3.bf16.msra.mxu1 (!%p3542_p0), %v2210_v8 }
 0x19e   : > { %1969 = vmatmul.mubr.msk.bf16.vlgmr.msra.gmra.mrb[0].mxu0 %vm681_vm1, %v2211_v9 }
 0x19f   : > { %1977 = vmatmul.mubr.msk.bf16.vlgmr.msra.gmra.mrb[0].mxu1 %vm681_vm1, %v2212_v10 }
 0x271   : > { %v753_v16 = vpop.f32.mrb[0].mxu0 }
 0x272   : > { %v754_v19 = vadd.f32 %v1866_v14, %v753_v16  ;;  %v870_v22 = vpop.f32.mrb[0].mxu1  ;;  %v1970_v23 = vpop.f32.mrb[1].mxu0 }
 0x273   : > { %v871_v24 = vadd.f32 %v1871_v15, %v870_v22  ;;  %v1978_v25 = vpop.f32.mrb[1].mxu1  ;;  %v756_v26 = vpop.f32.mrb[2].mxu0 }
 0x274   : > { %v873_v27 = vpop.f32.mrb[2].mxu1  ;;  %v1971_v28 = vpop.f32.mrb[3].mxu0  ;;  %v784_v29 = vmul.f32 %v767_v17, %v754_v19  ;;  %v786_v30 = vmul.f32 %v771_v18, %v754_v19  ;;  %v788_v32 = vmul.f32 %v775_v20, %v754_v19  ;;  %v790_v33 = vmul.f32 %v779_v21, %v754_v19 }
 0x275   : > { %v1979_v31 = vpop.f32.mrb[3].mxu1  ;;  %v757_v34 = vadd.f32 %v1866_v14, %v756_v26  ;;  %v874_v35 = vadd.f32 %v1871_v15, %v873_v27  ;;  %v877_v36 = vmul.f32 %v871_v24, %v767_v17  ;;  %v879_v37 = vmul.f32 %v871_v24, %v771_v18 }
 0x276   : > { %v881_v38 = vmul.f32 %v871_v24, %v775_v20  ;;  %v883_v39 = vmul.f32 %v871_v24, %v779_v21 }
 0x277   : > { %v785_v40 = vmul.f32 %v767_v17, %v757_v34  ;;  %v787_v41 = vmul.f32 %v771_v18, %v757_v34  ;;  %v789_v42 = vmul.f32 %v775_v20, %v757_v34  ;;  %v791_v43 = vmul.f32 %v779_v21, %v757_v34 }
 0x278   : > { %v878_v44 = vmul.f32 %v874_v35, %v767_v17  ;;  %v880_v45 = vmul.f32 %v874_v35, %v771_v18  ;;  %v882_v46 = vmul.f32 %v874_v35, %v775_v20  ;;  %v884_v47 = vmul.f32 %v874_v35, %v779_v21 }
 0x279   : > { %v792_v48 = vpack.c.bf16 %v785_v40, %v784_v29  ;;  %v793_v49 = vpack.c.bf16 %v787_v41, %v786_v30  ;;  %v794_v50 = vpack.c.bf16 %v789_v42, %v788_v32  ;;  %v795_v51 = vpack.c.bf16 %v791_v43, %v790_v33 }
 0x27a   : > { %v885_v52 = vpack.c.bf16 %v878_v44, %v877_v36  ;;  %v886_v53 = vpack.c.bf16 %v880_v45, %v879_v37  ;;  %v887_v54 = vpack.c.bf16 %v882_v46, %v881_v38  ;;  %v888_v55 = vpack.c.bf16 %v884_v47, %v883_v39 }
 0x27b   : > { %796 = vst.msk [vmem:[#allocation3] sm:$0xff] %vm681_vm1, %v792_v48  ;;  %797 = vst.msk [vmem:[#allocation3 + $0x8] sm:$0xff] %vm681_vm1, %v793_v49 }
 0x27c   : > { %798 = vst.msk [vmem:[#allocation3 + $0x10] sm:$0xff] %vm681_vm1, %v794_v50  ;;  %799 = vst.msk [vmem:[#allocation3 + $0x18] sm:$0xff] %vm681_vm1, %v795_v51 }
 0x27d   : > { %890 = vst.msk [vmem:[#allocation3 + $0x20] sm:$0xff] %vm681_vm1, %v885_v52  ;;  %891 = vst.msk [vmem:[#allocation3 + $0x28] sm:$0xff] %vm681_vm1, %v886_v53 }
 0x27e   : > { %892 = vst.msk [vmem:[#allocation3 + $0x30] sm:$0xff] %vm681_vm1, %v887_v54  ;;  %893 = vst.msk [vmem:[#allocation3 + $0x38] sm:$0xff] %vm681_vm1, %v888_v55 }
 0x27f PF: > { %v2213_v56 = vld [vmem:[%s3268_s3] sm:$0xff]   ;;  %v2735_v57 = vmov 0.0   ;;  %v2214_v58 = vld [vmem:[%s3268_s3 + $0x8] sm:$0xff]   ;;  %vm2736_vm2 = vmmov 0   ;;  %s894_s22 = sld [smem:[#allocation5 + %s2861_s19]]  ;;  %vm933_vm3 = vcmask 261120  }
 0x280   : > { %1980 = vmatprep.subr.bf16.mxu0 %v2735_v57  ;;  %1988 = vmatprep.subr.bf16.mxu1 %v2735_v57  ;;  %s3331_s20 = sld [smem:[#allocation6 + %s2861_s19]]  ;;  %v1878_v61 = vld [vmem:[%s577_s5] ss:$0 sm:$0xff]  ;;  %v2216_v13 = vld [vmem:[%s3275_s18] sm:$0xff]   ;;  %vm1142_vm4 = vcmask 130048   ;;  %p1900_p4 = scmp.ne.s32.totalorder %s2861_s19, 2 }
 0x281   : > { %1981 = vmatpush3.bf16.msra.mxu0 %v2213_v56  ;;  %1984 = vmatprep.mubr.msk.bf16.mxu0 %vm2736_vm2, %v2735_v57  ;;  %v2217_v14 = vld [vmem:[%s3275_s18 + $0x8] sm:$0xff]  }
 0x282   : > { %1982 = vmatprep.subr.bf16.mxu0 %v2735_v57  ;;  %1992 = vmatprep.mubr.msk.bf16.mxu1 %vm2736_vm2, %v2735_v57  ;;  %v3346_v15 = vld [vmem:[%s3261_s9] sm:$0xff]  }
 0x283   : > { %1989 = vmatpush3.bf16.msra.mxu1 %v2216_v13  ;;  %v1920_v16 = vunpack.c.l.bf16 %v3346_v15  ;;  %v1921_v17 = vunpack.c.h.bf16 %v3346_v15 }
 0x284   : > { %1990 = vmatprep.subr.bf16.mxu1 %v2735_v57 }
 0x285   : > { %1983 = vmatpush3.bf16.msra.mxu0 %v2214_v58  ;;  %s1916_s8 = sshll.u32 %s894_s22, 3  ;;  %v1893_v18 = vadd.f32 -1.0, %v1920_v16  ;;  %v1894_v19 = vadd.f32 -1.0, %v1921_v17 }
 0x286   : > { %s898_s11 = scalar_lea.vmem [#allocation7], %s1916_s8  ;;  %s1917_s16 = sshll.u32 %s3331_s20, 5 }
 0x287   : > { %v2215_v59 = vld [vmem:[%s898_s11] sm:$0xff]   ;;  %s1044_s1 = scalar_lea.vmem [#allocation3], %s1917_s16  ;;  %1991 = vmatpush3.bf16.msra.mxu1 %v2217_v14  ;;  %v1132_v20 = vmul.f32 1e+30, %v1893_v18  ;;  %v1133_v21 = vmul.f32 1e+30, %v1894_v19 }
 0x288   : > { %1985 = vmatmul.mubr.msk.bf16.vlgmr.msra.gmra.mrb[0].mxu0 %vm933_vm3, %v2215_v59  ;;  %v1045_v60 = vld [vmem:[%s1044_s1] sm:$0xff]  ;;  %v1046_v10 = vld [vmem:[%s1044_s1 + $0x8] sm:$0xff]  ;;  %v1047_v11 = vld [vmem:[%s1044_s1 + $0x10] sm:$0xff]  ;;  %s1899_s7 = sshll.u32 %s3331_s20, 4 }
 0x289   : > { %1998 = vmatprep.mubr.msk.bf16.mxu0 %vm933_vm3, %v1045_v60  ;;  %v1048_v12 = vld [vmem:[%s1044_s1 + $0x18] sm:$0xff]  ;;  %s1374_s27 = scalar_lea.vmem [#allocation2], %s1899_s7 }
 0x28a   : > { %1993 = vmatmul.mubr.msk.bf16.vlgmr.msra.gmra.mrb[0].mxu1 %vm933_vm3, %v2215_v59 }
 0x35b   : > { %v971_v62 = vpop.f32.mrb[0].mxu0 }
 0x35c   : > { %v1986_v63 = vpop.f32.mrb[1].mxu0  ;;  %v972_v5 = vadd.f32 %v1878_v61, %v971_v62 }
 0x35d   : > { %v974_v4 = vpop.f32.mrb[2].mxu0 }
 0x35e   : > { %v975_v6 = vadd.f32 %v1878_v61, %v974_v4  ;;  %v1987_v7 = vpop.f32.mrb[3].mxu0 }
 0x360   : > { %v1049_v8 = vpack.c.bf16 %v975_v6, %v972_v5 }
 0x362   : > { %2054 = vmatprep.subr.msk.bf16.mxu0 %vm933_vm3, %v1049_v8  ;;  %v1063_v9 = vsel %vm933_vm3, %v1049_v8, 0 }
 0x363   : > { %1997 = vmatpush3.bf16.xpose.msra.mxu0 %v1063_v9 }
 0x36a   : > { %1999 = vmatmul.mubr.msk.bf16.vlgmr.msra.gmra.mrb[4].mxu0 %vm933_vm3, %v1046_v10 }
 0x36b   : > { %2002 = vmatprep.mubr.msk.bf16.mxu0 %vm933_vm3, %v1047_v11 }
 0x372   : > { %2003 = vmatmul.mubr.msk.bf16.gmra.mrb[8].mxu0 %vm933_vm3, %v1048_v12 }
 0x43d   : > { %v2000_v22 = vpop.f32.mrb[4].mxu0 }
 0x43e   : > { %v1136_v23 = vadd.f32 %v2000_v22, %v1132_v20  ;;  %v1099_v24 = vpop.f32.mrb[5].mxu0 }
 0x43f   : > { %v1134_v25 = vadd.f32 %v1132_v20, %v1099_v24  ;;  %v2001_v26 = vpop.f32.mrb[6].mxu0 }
 0x440   : > { %v1137_v27 = vadd.f32 %v2001_v26, %v1133_v21  ;;  %v1102_v28 = vpop.f32.mrb[7].mxu0  ;;  %v1149_v29 = vsel %vm1142_vm4, %v1136_v23, -inf }
 0x441   : > { %v1135_v30 = vadd.f32 %v1133_v21, %v1102_v28  ;;  %1150 = vmax.xlane.f32.xlu1 %v1149_v29  ;;  %v1143_v31 = vsel %vm1142_vm4, %v1134_v25, -inf  ;;  %v1035_v29 = vpop.f32.mrb[0].mxu1 }
 0x442   : > { %1144 = vmax.xlane.f32.xlu0 %v1143_v31  ;;  %v1152_v32 = vsel %vm1142_vm4, %v1137_v27, -inf  ;;  %v1883_v31 = vld [vmem:[%s594_s21] ss:$0 sm:$0xff] }
 0x443   : > { %v1146_v34 = vsel %vm1142_vm4, %v1135_v30, -inf }
 0x445   : > { %1153 = vmax.xlane.f32.xlu1 %v1152_v32  ;;  %v2004_v33 = vpop.f32.mrb[8].mxu0 }
 0x446   : > { %1147 = vmax.xlane.f32.xlu0 %v1146_v34  ;;  %v1115_v35 = vpop.f32.mrb[9].mxu0  ;;  %v1140_v39 = vadd.f32 %v2004_v33, %v1132_v20  ;;  %v1036_v33 = vadd.f32 %v1883_v31, %v1035_v29 }
 0x447   : > { %v1138_v36 = vadd.f32 %v1132_v20, %v1115_v35  ;;  %v2005_v37 = vpop.f32.mrb[10].mxu0 }
 0x448   : > { %v1118_v38 = vpop.f32.mrb[11].mxu0  ;;  %v1141_v42 = vadd.f32 %v2005_v37, %v1133_v21  ;;  %v1161_v44 = vsel %vm1142_vm4, %v1140_v39, -inf  ;;  %v1359_v37 = vsel %vm1142_vm4, %v1920_v16, -inf }
 0x449   : > { %v1139_v40 = vadd.f32 %v1133_v21, %v1118_v38  ;;  %v1155_v41 = vsel %vm1142_vm4, %v1138_v36, -inf  ;;  %v1362_v38 = vsel %vm1142_vm4, %v1921_v17, -inf }
 0x44a   : > { %1156 = vmax.xlane.f32.xlu0 %v1155_v41  ;;  %v1164_v45 = vsel %vm1142_vm4, %v1141_v42, -inf }
 0x44b   : > { %v1158_v43 = vsel %vm1142_vm4, %v1139_v40, -inf }
 0x44c   : > { %1159 = vmax.xlane.f32.xlu1 %v1158_v43 }
 0x44e   : > { %1162 = vmax.xlane.f32.xlu0 %v1161_v44 }
 0x450   : > { %1165 = vmax.xlane.f32.xlu1 %v1164_v45 }
 0x4ce   : > { %v1151_v46 = vpop.xlane.xlu1 %1150 }
 0x4cf   : > { %v1169_v47 = vsub.f32 %v1136_v23, %v1151_v46  ;;  %v1145_v48 = vpop.xlane.xlu0 %1144 }
 0x4d0   : > { %v1167_v49 = vsub.f32 %v1134_v25, %v1145_v48 }
 0x4d1   : > { %v1179_v50 = vmul.f32 1.442695, %v1169_v47 }
 0x4d2   : > { %v1175_v51 = vmul.f32 1.442695, %v1167_v49  ;;  %v1154_v52 = vpop.xlane.xlu1 %1153 }
 0x4d3   : > { %v1170_v53 = vsub.f32 %v1137_v27, %v1154_v52  ;;  %v1148_v54 = vpop.xlane.xlu0 %1147 }
 0x4d4   : > { %2218 = vpow2.f32 %v1175_v51  ;;  %v1168_v55 = vsub.f32 %v1135_v30, %v1148_v54  ;;  %v1994_v30 = vpop.f32.mrb[1].mxu1 }
 0x4d5   : > { %2220 = vpow2.f32 %v1179_v50  ;;  %v1181_v56 = vmul.f32 1.442695, %v1170_v53  ;;  %v1038_v32 = vpop.f32.mrb[2].mxu1 }
 0x4d6   : > { %v1177_v57 = vmul.f32 1.442695, %v1168_v55  ;;  %v1039_v34 = vadd.f32 %v1883_v31, %v1038_v32  ;;  %v1995_v35 = vpop.f32.mrb[3].mxu1 }
 0x4d7   : > { %v1157_v58 = vpop.xlane.xlu0 %1156 }
 0x4d8   : > { %2222 = vpow2.f32 %v1177_v57  ;;  %v1171_v59 = vsub.f32 %v1138_v36, %v1157_v58  ;;  %v1235_v36 = vpack.c.bf16 %v1039_v34, %v1036_v33 }
 0x4d9   : > { %v1160_v60 = vpop.xlane.xlu1 %1159  ;;  %2224 = vpow2.f32 %v1181_v56 }
 0x4da   : > { %v1183_v61 = vmul.f32 1.442695, %v1171_v59  ;;  %v1172_v62 = vsub.f32 %v1139_v40, %v1160_v60  ;;  %2006 = vmatprep.subr.bf16.mxu1 %v1235_v36 }
 0x4db   : > { %v1163_v63 = vpop.xlane.xlu0 %1162  ;;  %2007 = vmatpush3.bf16.msra.mxu1 %v1235_v36 }
 0x4dc   : > { %2226 = vpow2.f32 %v1183_v61  ;;  %v1185_v4 = vmul.f32 1.442695, %v1172_v62  ;;  %v1173_v5 = vsub.f32 %v1140_v39, %v1163_v63 }
 0x4dd   : > { %v1166_v6 = vpop.xlane.xlu1 %1165 }
 0x4de   : > { %v2219_v7 = vpop.eup %2218  ;;  %2228 = vpow2.f32 %v1185_v4  ;;  %v1187_v8 = vmul.f32 1.442695, %v1173_v5  ;;  %v1174_v9 = vsub.f32 %v1141_v42, %v1166_v6  ;;  %v1317_v4 = vlaneseq }
 0x4df   : > { %v1191_v10 = vsel %vm1142_vm4, %v2219_v7, 0.0  ;;  %v2221_v11 = vpop.eup %2220 }
 0x4e0   : > { %2230 = vpow2.f32 %v1187_v8  ;;  %v1189_v12 = vmul.f32 1.442695, %v1174_v9  ;;  %1192 = vadd.xlane.f32.xlu0 %v1191_v10  ;;  %v1197_v14 = vsel %vm1142_vm4, %v2221_v11, 0.0  ;;  %v1318_v5 = vshrl.u32 %v1317_v4, 7 }
 0x4e2   : > { %v2223_v13 = vpop.eup %2222  ;;  %2232 = vpow2.f32 %v1189_v12  ;;  %v1319_v6 = vsub.s32 0, %v1318_v5  ;;  %v1923_v5 = vld [vmem:[#allocation7] sm:$0xff] (!%p1900_p4)  }
 0x4e3   : > { %v1194_v18 = vsel %vm1142_vm4, %v2223_v13, 0.0  ;;  %v2225_v19 = vpop.eup %2224 }
 0x4e4   : > { %1198 = vadd.xlane.f32.xlu0 %v1197_v14  ;;  %1195 = vadd.xlane.f32.xlu1 %v1194_v18  ;;  %v1200_v22 = vsel %vm1142_vm4, %v2225_v19, 0.0  ;;  %v1320_v8 = vrot.slane %v3298_v0, %v1319_v6  ;;  %v1332_v0 = vrot.slane %v3304_v3, %v1319_v6 }
 0x4e6   : > { %v2227_v20 = vpop.eup %2226 }
 0x4e7   : > { %v1203_v21 = vsel %vm1142_vm4, %v2227_v20, 0.0 }
 0x4e8   : > { %v2229_v23 = vpop.eup %2228  ;;  %1204 = vadd.xlane.f32.xlu0 %v1203_v21  ;;  %1201 = vadd.xlane.f32.xlu1 %v1200_v22 }
 0x4e9   : > { %v1206_v26 = vsel %vm1142_vm4, %v2229_v23, 0.0 }
 0x4ea   : > { %v2231_v24 = vpop.eup %2230 }
 0x4eb   : > { %v1209_v25 = vsel %vm1142_vm4, %v2231_v24, 0.0 }
 0x4ec   : > { %v2233_v27 = vpop.eup %2232  ;;  %1210 = vadd.xlane.f32.xlu0 %v1209_v25  ;;  %1207 = vadd.xlane.f32.xlu1 %v1206_v26 }
 0x4ed   : > { %v1212_v28 = vsel %vm1142_vm4, %v2233_v27, 0.0 }
 0x4f0   : > { %1213 = vadd.xlane.f32.xlu1 %v1212_v28  ;;  %1360 = vmax.xlane.f32.xlu0 %v1359_v37 }
 0x4f4   : > { %1363 = vmax.xlane.f32.xlu1 %v1362_v38 }
 0x56d   : > { %v1193_v39 = vpop.xlane.xlu0 %1192 }
 0x56e   : > { %2234 = vrcp.f32 %v1193_v39  ;;  %v1375_v39 = vld [vmem:[%s1374_s27] sm:$0xff] }
 0x571   : > { %v1199_v40 = vpop.xlane.xlu0 %1198  ;;  %v1196_v41 = vpop.xlane.xlu1 %1195 }
 0x572   : > { %2236 = vrcp.f32 %v1196_v41 }
 0x573   : > { %2238 = vrcp.f32 %v1199_v40 }
 0x575   : > { %v1205_v42 = vpop.xlane.xlu0 %1204  ;;  %v1202_v43 = vpop.xlane.xlu1 %1201 }
 0x576   : > { %2240 = vrcp.f32 %v1202_v43 }
 0x577   : > { %2242 = vrcp.f32 %v1205_v42 }
 0x578   : > { %v2235_v46 = vpop.eup %2234 }
 0x579   : > { %v1211_v44 = vpop.xlane.xlu0 %1210  ;;  %v1208_v45 = vpop.xlane.xlu1 %1207  ;;  %v1223_v17 = vmul.f32 %v2235_v46, %v2219_v7  ;;  %v1324_v7 = vrot.slane %v3300_v1, %v1319_v6 }
 0x57a   : > { %2244 = vrcp.f32 %v1208_v45 }
 0x57b   : > { %2246 = vrcp.f32 %v1211_v44  ;;  %v1376_v44 = vld [vmem:[%s1374_s27 + $0x8] sm:$0xff] }
 0x57c   : > { %v2237_v15 = vpop.eup %2236 }
 0x57d   : > { %v1214_v16 = vpop.xlane.xlu1 %1213  ;;  %v1224_v47 = vmul.f32 %v2237_v15, %v2223_v13  ;;  %v2239_v48 = vpop.eup %2238 }
 0x57e   : > { %2248 = vrcp.f32 %v1214_v16  ;;  %v1225_v51 = vmul.f32 %v2239_v48, %v2221_v11  ;;  %v1361_v32 = vpop.xlane.xlu0 %1360  ;;  %v1387_v16 = vld [vmem:[#allocation22] sm:$0xff] (!%p1900_p4) }
 0x57f   : > { %v1231_v49 = vpack.c.bf16 %v1224_v47, %v1223_v17  ;;  %vm1365_vm5 = vcmp.gt.f32.partialorder %v1361_v32, 0.0  ;;  %v1388_v17 = vld [vmem:[#allocation22 + $0x8] sm:$0xff] (!%p1900_p4)  ;;  %v1503_v47 = vld [vmem:[#allocation22 + $0x20] sm:$0xff] (!%p1900_p4) }
 0x580   : > { %v2241_v50 = vpop.eup %2240  ;;  %v2038_v48 = vpack.c.bf16 (!%p1900_p4), %v1388_v17, %v1387_v16 }
 0x581   : > { %v1226_v52 = vmul.f32 %v2241_v50, %v2225_v19  ;;  %2008 = vmatprep.mubr.msk.bf16.mxu1 %vm1142_vm4, %v1231_v49  ;;  %v2243_v53 = vpop.eup %2242  ;;  %v1364_v37 = vpop.xlane.xlu1 %1363  ;;  %v1504_v49 = vld [vmem:[#allocation22 + $0x28] sm:$0xff] (!%p1900_p4)  ;;  %v1389_v50 = vld [vmem:[#allocation22 + $0x10] sm:$0xff] (!%p1900_p4) }
 0x582   : > { %v1227_v57 = vmul.f32 %v2243_v53, %v2227_v20  ;;  %vm1366_vm6 = vcmp.gt.f32.partialorder %v1364_v37, 0.0  ;;  %v2046_v53 = vpack.c.bf16 (!%p1900_p4), %v1504_v49, %v1503_v47  ;;  %2039 = vmatprep.subr.bf16.mxu0 (!%p1900_p4), %v2038_v48 }
 0x583   : > { %v1232_v54 = vpack.c.bf16 %v1226_v52, %v1225_v51  ;;  %v1390_v51 = vld [vmem:[#allocation22 + $0x18] sm:$0xff] (!%p1900_p4)  ;;  %v2737_v52 = vmov (!%p1900_p4), 0   ;;  %2041 = vmatpush3.bf16.msra.mxu0 (!%p1900_p4), %v2038_v48 }
 0x584   : > { %v2245_v55 = vpop.eup %2244  ;;  %2250 = vset.pattern.permute.xlu0 (!%p1900_p4), %v2737_v52  ;;  %2047 = vmatprep.subr.bf16.mxu1 (!%p1900_p4), %v2046_v53 }
 0x585   : > { %v2247_v56 = vpop.eup %2246  ;;  %2009 = vmatmul.mubr.msk.bf16.vlgmr.msra.gmra.mrb[4].mxu1 %vm1142_vm4, %v1232_v54  ;;  %v1228_v58 = vmul.f32 %v2245_v55, %v2229_v23  ;;  %v2042_v54 = vpack.c.bf16 (!%p1900_p4), %v1390_v51, %v1389_v50  ;;  %v1505_v55 = vld [vmem:[#allocation22 + $0x30] sm:$0xff] (!%p1900_p4) }
 0x586   : > { %v1229_v61 = vmul.f32 %v2247_v56, %v2231_v24  ;;  %v1328_v24 = vrot.slane %v3302_v2, %v1319_v6  ;;  %v1506_v56 = vld [vmem:[#allocation22 + $0x38] sm:$0xff] (!%p1900_p4)  ;;  %2049 = vmatpush3.bf16.msra.mxu1 (!%p1900_p4), %v2046_v53 }
 0x587   : > { %v1233_v60 = vpack.c.bf16 %v1228_v58, %v1227_v57  ;;  %v2050_v58 = vpack.c.bf16 (!%p1900_p4), %v1506_v56, %v1505_v55  ;;  %2043 = vmatprep.subr.bf16.mxu0 (!%p1900_p4), %v2042_v54  ;;  %v1927_v6 = vld [vmem:[#allocation7 + $0x8] sm:$0xff] (!%p1900_p4)  }
 0x588   : > { %v2249_v59 = vpop.eup %2248  ;;  %2045 = vmatpush3.bf16.msra.mxu0 (!%p1900_p4), %v2042_v54 }
 0x589   : > { %v1230_v62 = vmul.f32 %v2249_v59, %v2233_v27  ;;  %2012 = vmatprep.mubr.msk.bf16.mxu1 %vm1142_vm4, %v1233_v60  ;;  %v1904_v60 = vld [vmem:[#allocation25] ss:$0 sm:$0xff] (!%p1900_p4)  ;;  %2051 = vmatprep.subr.bf16.mxu1 (!%p1900_p4), %v2050_v58 }
 0x58a   : > { %1490 = vperm.xlu0 (!%p1900_p4), %2250, %v1904_v60   ;;  %2053 = vmatpush3.bf16.msra.mxu1 (!%p1900_p4), %v2050_v58 }
 0x58b   : > { %v1234_v63 = vpack.c.bf16 %v1230_v62, %v1229_v61  ;;  %v1908_v62 = vld [vmem:[#allocation25 + $0x1] ss:$0 sm:$0xff] (!%p1900_p4) }
 0x58d   : > { %2013 = vmatmul.mubr.msk.bf16.gmra.mrb[8].mxu1 %vm1142_vm4, %v1234_v63 }
 0x58e   : > { %1609 = vperm.xlu0 (!%p1900_p4), %2250, %v1908_v62  }
 0x609   : > { %v1491_v4 = vpop.permute.xlu0 (!%p1900_p4), %1490 }
 0x658   : > { %v2010_v9 = vpop.f32.mrb[4].mxu1 }
 0x659   : > { %v1339_v10 = vmul.f32 %v2010_v9, %v1324_v7  ;;  %v1282_v11 = vpop.f32.mrb[5].mxu1  ;;  %v1929_v9 = vunpack.c.h.bf16 (!%p1900_p4), %v1927_v6 }
 0x65a   : > { %v1337_v12 = vmul.f32 %v1320_v8, %v1282_v11  ;;  %v2011_v13 = vpop.f32.mrb[6].mxu1  ;;  %v1928_v11 = vunpack.c.l.bf16 (!%p1900_p4), %v1927_v6 }
 0x65b   : > { %v1346_v14 = vsel %vm933_vm3, %v1339_v10, 0.0  ;;  %v1340_v18 = vmul.f32 %v2011_v13, %v1324_v7  ;;  %v1285_v19 = vpop.f32.mrb[7].mxu1  ;;  %v1925_v7 = vunpack.c.h.bf16 (!%p1900_p4), %v1923_v5  ;;  %v1901_v10 = vld [vmem:[#allocation24] ss:$0 sm:$0xff] (!%p1900_p4)  ;;  %v1905_v13 = vld [vmem:[#allocation24 + $0x1] ss:$0 sm:$0xff] (!%p1900_p4) }
 0x65c   : > { %v1345_v20 = vsel %vm933_vm3, %v1337_v12, 0.0  ;;  %v1338_v21 = vmul.f32 %v1320_v8, %v1285_v19  ;;  %v1924_v8 = vunpack.c.l.bf16 (!%p1900_p4), %v1923_v5  ;;  %v1610_v12 = vpop.permute.xlu0 (!%p1900_p4), %1609 }
 0x65d   : > { %v1347_v22 = vadd.f32 %v1346_v14, %v1345_v20  ;;  %v1353_v23 = vsel %vm933_vm3, %v1340_v18, 0.0  ;;  %v1494_v18 = vmul.f32 (!%p1900_p4), %v1925_v7, %v1491_v4 }
 0x65e   : > { %v1352_v1 = vsel %vm933_vm3, %v1338_v21, 0.0 }
 0x65f   : > { %v1354_v25 = vadd.f32 %v1353_v23, %v1352_v1  ;;  %v1613_v23 = vmul.f32 (!%p1900_p4), %v1929_v9, %v1610_v12 }
 0x660   : > { %v2014_v26 = vpop.f32.mrb[8].mxu1 }
 0x661   : > { %v1298_v27 = vpop.f32.mrb[9].mxu1  ;;  %v1343_v28 = vmul.f32 %v2014_v26, %v1332_v0 }
 0x662   : > { %v1341_v29 = vmul.f32 %v1328_v24, %v1298_v27  ;;  %v2015_v30 = vpop.f32.mrb[10].mxu1 }
 0x663   : > { %v1301_v31 = vpop.f32.mrb[11].mxu1  ;;  %v1344_v34 = vmul.f32 %v2015_v30, %v1332_v0  ;;  %v1350_v38 = vsel %vm933_vm3, %v1343_v28, 0.0 }
 0x664   : > { %v1348_v33 = vsel %vm933_vm3, %v1341_v29, 0.0  ;;  %v1342_v35 = vmul.f32 %v1328_v24, %v1301_v31 }
 0x665   : > { %v1349_v36 = vadd.f32 %v1348_v33, %v1347_v22  ;;  %v1357_v41 = vsel %vm933_vm3, %v1344_v34, 0.0  ;;  %v1493_v22 = vmul.f32 (!%p1900_p4), %v1924_v8, %v1491_v4 }
 0x666   : > { %v1355_v3 = vsel %vm933_vm3, %v1342_v35, 0.0 }
 0x667   : > { %v1356_v2 = vadd.f32 %v1355_v3, %v1354_v25  ;;  %v1351_v40 = vadd.f32 %v1350_v38, %v1349_v36  ;;  %v1612_v25 = vmul.f32 (!%p1900_p4), %v1928_v11, %v1610_v12 }
 0x668   : > { %1384 = sbr.rel (%p1900_p4) target bundleno = 1873 (0x751), region = 124 }
 0x669   : > { %v1371_v42 = vsel %vm1365_vm5, %v1351_v40, 0.0  ;;  %v1358_v43 = vadd.f32 %v1357_v41, %v1356_v2 }
 0x66a   : > { %v1377_v45 = vadd.f32 %v1375_v39, %v1371_v42 }
 0x66b   : > { %v1372_v46 = vsel %vm1366_vm6, %v1358_v43, 0.0 }
 0x66c   : > { %1379 = vst.msk [vmem:[%s1374_s27] sm:$0xff] %vm933_vm3, %v1377_v45  ;;  %v1378_v15 = vadd.f32 %v1376_v44, %v1372_v46 }
 0x66e   : > { %1380 = vst.msk [vmem:[%s1374_s27 + $0x8] sm:$0xff] %vm933_vm3, %v1378_v15 }
 0x675   : > { %v1385_v57 = vld [vmem:[#allocation2] sm:$0xff]  ;;  %v1500_v59 = vld [vmem:[#allocation2 + $0x10] sm:$0xff]  ;;  %v1386_v61 = vld [vmem:[#allocation2 + $0x8] sm:$0xff] }
 0x676   : > { %2024 = vmatprep.mubr.msk.f32.mxu0 %vm933_vm3, %v1385_v57  ;;  %2035 = vmatprep.mubr.msk.f32.mxu1 %vm933_vm3, %v1500_v59  ;;  %v1501_v63 = vld [vmem:[#allocation2 + $0x18] sm:$0xff] }
 0x677   : > { %2025 = vmatmul.mubr.msk.f32.vlgmr.msra.gmra.mrb[0].mxu0 %vm933_vm3, %v1386_v61  ;;  %2036 = vmatmul.mubr.msk.f32.vlgmr.msra.gmra.mrb[0].mxu1 %vm933_vm3, %v1501_v63 }
 0x74a   : > { %v2026_v14 = vpop.f32.mrb[0].mxu0  ;;  %v2037_v20 = vpop.f32.mrb[0].mxu1 }
 0x74b   : > { %v1476_v19 = vadd.f32 %v2026_v14, %v1901_v10  ;;  %v1470_v21 = vpop.f32.mrb[1].mxu0  ;;  %v1593_v1 = vadd.f32 %v2037_v20, %v1905_v13  ;;  %v1587_v24 = vpop.f32.mrb[1].mxu1 }
 0x74c   : > { %v1471_v0 = vadd.f32 %v1901_v10, %v1470_v21  ;;  %v1588_v27 = vadd.f32 %v1905_v13, %v1587_v24 }
 0x74d   : > { %v1496_v26 = vadd.f32 %v1494_v18, %v1476_v19  ;;  %v1615_v28 = vadd.f32 %v1613_v23, %v1593_v1 }
 0x74e   : > { %v1495_v29 = vadd.f32 %v1493_v22, %v1471_v0  ;;  %v1614_v30 = vadd.f32 %v1612_v25, %v1588_v27 }
 0x74f   : > { %1498 = vst.msk [vmem:[#allocation27 + $0x8] sm:$0xff] %vm933_vm3, %v1496_v26  ;;  %1618 = vst.msk [vmem:[#allocation27 + $0x18] sm:$0xff] %vm933_vm3, %v1615_v28 }
 0x750   : > { %1497 = vst.msk [vmem:[#allocation27] sm:$0xff] %vm933_vm3, %v1495_v29  ;;  %1617 = vst.msk [vmem:[#allocation27 + $0x10] sm:$0xff] %vm933_vm3, %v1614_v30 }
 0x751 PF: > { %p2150_p12 = scmp.eq.s32.totalorder %s2861_s19, 2  ;;  %s2738_s30 = smov [#allocation27]  }
 0x752   : > { %s1625_s15 = sshll.u32 %s2738_s30, 4  ;;  %s1626_s15 = int_to_ptr.vmem [resolvable:$true] %s1625_s15 }
 0x753   : > { %s2617_s28 = scalar_lea.vmem %s1626_s15, 512  ;;  %p2624_p13 = scmp.lt.s32.totalorder %s1626_s15, %s1626_s15 }
 0x754   : > { %p2618_p8 = scmp.ne.s32.totalorder %s1626_s15, %s2617_s28  ;;  %p2625_p7 = scmp.lt.s32.totalorder %s2617_s28, %s2617_s28 }
 0x756   : > { %p2619_p9 = pnand %p2618_p8, %p2150_p12  ;;  %p2626_p6 = por %p2625_p7, %p2624_p13 }
 0x758   : > { %p2620_p5 = pneg %p2619_p9 }
 0x75a   : > { %p2627_p11 = pnand %p2626_p6, %p2620_p5 }
 0x75c   : > { %2630 = shalt.err (!%p2627_p11)
}
 0x75d   : > { %s3543_s25 = sld [smem:[#allocation50_spill]] }
 0x763   : > { %s2631_s14 = scalar_lea.hbm %s3543_s25, 512 }
 0x764   : > { %p2632_p2 = scmp.ne.s32.totalorder %s3543_s25, %s2631_s14  ;;  %p2637_p3 = scmp.lt.u32.totalorder %s2631_s14, %s3543_s25 }
 0x766   : > { %p2633_p10 = pnand %p2632_p2, %p2150_p12 }
 0x768   : > { %p2634_p1 = pneg %p2633_p10 }
 0x76a   : > { %p2639_p0 = pnand %p2637_p3, %p2634_p1 }
 0x76c   : > { %2642 = shalt.err (!%p2639_p0)
}
 0x76d   : > { %s2739_s5 = smov 128   ;;  %s2740_s18 = smov 8  }
 0x76e   : > { %2094 = dma.vmem_to_hbm [thread:$0]  (%p2150_p12), %s1626_s15, 512, %s3543_s25, [#allocation9], %s2739_s5, %s2739_s5, %s2740_s18  }
 0x76f   : > { %2694 = dma.done.wait (%p2150_p12), [#allocation9], 512  }
 0x770   : > { %2696 = vsyncadd (%p2150_p12), [#allocation9], 4294966784 }
 0x771 PF: > { %s3544_s1 = sld [smem:[#allocation40_spill]]  ;;  %s3545_s22 = sld [smem:[#allocation38_spill]] }
 0x772   : > { %s3546_s18 = sld [smem:[#allocation41_spill]]  ;;  %s3547_s0 = smov %s2703_s17 }
 0x777   : > { %p41_p4 = scmp.ge.s32.totalorder %s3544_s1, 5   ;;  %s3548_s17 = smov %s3545_s22 }
 0x779   :  { %43 = sbr.rel (!%p41_p4) target bundleno = 35 (0x23), region = 203 }
 0x780   :  { %1641 = vsyncpa [#allocation8], 1 }
 0x781   :  { %1643 = vsyncpa [#allocation8 + $0x1], 1 }
 0x782   :  { %1644 = vsyncpa [#allocation11], 1 }
 0x783   :  { %1646 = vsyncpa [#allocation11 + $0x1], 1 }
 0x784   :  { %1647 = vsyncpa [#allocation14], 1 }
 0x785   :  { %1649 = vsyncpa [#allocation14 + $0x1], 1 }
 0x786   :  { %1650 = vsyncpa [#allocation17], 1 }
 0x787   :  { %1652 = vsyncpa [#allocation17 + $0x1], 1 }
 0x788   :  { %1653 = vsyncpa [#allocation20], 1 }
 0x789   :  { %1654 = vsyncpa [#allocation23], 1 }
 0x78a   :  { %1655 = vsyncpa [#allocation26], 1 }
 0x78b   :  { %1656 = vsyncpa [#allocation9], 1 }
 0x78c   :  { %1658 = vsyncpa [#allocation9 + $0x1], 1 }

</bundles_post_ra>
